<compile_context>
chip_gen: v6e
topology: v6e:2x2x1
jax: 0.10.0
libtpu: 0.0.40
codegen_flags: <defaults>
</compile_context>

<pallas_src>
import functools

import jax
import jax.numpy as jnp
from jax.experimental import pallas as pl
from jax.experimental.pallas import tpu as pltpu

EPS = 1e-5
WEIGHT_DTYPE = jnp.bfloat16
NEG_INF = -1e30  # finite additive mask (robust vs exp(-inf - -inf) NaN)


def _layernorm(x, g, b):
    mu = jnp.mean(x, axis=-1, keepdims=True)
    var = jnp.mean((x - mu) ** 2, axis=-1, keepdims=True)
    return (x - mu) * jax.lax.rsqrt(var + EPS) * g + b


# ----------------------------- fused Pallas kernel ---------------------------


def fused_kernel(x_ref, pos_ref, mask_ref, eot_ref,     # (Bt,S,D)(S,D)(S,S)(Bt,S)
                 ln1_g, ln1_b, wqkv, bqkv, wo, bo,
                 ln2_g, ln2_b, wfc, bfc, wpr, bpr,
                 lnf_g, lnf_b, proj,
                 o_ref,                                  # (Bt, E)
                 acc_ref,                                # VMEM scratch (Bt,S,D) f32
                 *, num_heads, num_layers):
    # program_id read ONCE at top level and closed over (never inside pl.when).
    l = pl.program_id(1)
    Bt, S, D = acc_ref.shape
    H = num_heads
    hd = D // H
    scale = 1.0 / (hd ** 0.5)

    # ---- layer 0: load prompts and add positional embedding (fused) --------
    @pl.when(l == 0)
    def _():
        acc_ref[...] = x_ref[...] + pos_ref[...][None, :, :]

    x = acc_ref[...]                            # (Bt, S, D) f32 residual

    # ---- multi-head causal self-attention (pre-norm) ------------------------
    h = _layernorm(x, ln1_g[0], ln1_b[0])
    qkv = jnp.dot(h.reshape(Bt * S, D).astype(jnp.bfloat16), wqkv[0],
                  preferred_element_type=jnp.float32) + bqkv[0]
    qkv = qkv.reshape(Bt, S, 3 * D)

    mask = mask_ref[...][None, :, :]            # (1, S, S) additive
    wo_l = wo[0]                                # (D, D) bf16, loaded once
    attn_acc = jnp.zeros((Bt * S, D), jnp.float32)
    # TODO(synk): at production hd=64 pack head pairs into 128-lane slabs to
    # avoid misaligned lane slices; trivially aligned at toy dims.
    for hh in range(H):                         # per-head, all matmuls in bf16
        q_h = qkv[:, :, hh * hd:(hh + 1) * hd].astype(jnp.bfloat16)
        k_h = qkv[:, :, D + hh * hd:D + (hh + 1) * hd].astype(jnp.bfloat16)
        v_h = qkv[:, :, 2 * D + hh * hd:2 * D + (hh + 1) * hd].astype(jnp.bfloat16)
        s_h = jnp.einsum('bqd,bkd->bqk', q_h, k_h,
                         preferred_element_type=jnp.float32) * scale + mask
        s_h = s_h - jnp.max(s_h, axis=-1, keepdims=True)
        p_h = jnp.exp(s_h)
        p_h = p_h / jnp.sum(p_h, axis=-1, keepdims=True)
        head = jnp.einsum('bqk,bkd->bqd', p_h.astype(jnp.bfloat16), v_h,
                          preferred_element_type=jnp.float32)   # (Bt,S,hd) f32
        # fold the output projection in per head -> no concatenate, wo matmul
        # overlaps the head loop.
        attn_acc = attn_acc + jnp.dot(
            head.reshape(Bt * S, hd).astype(jnp.bfloat16),
            wo_l[hh * hd:(hh + 1) * hd, :],
            preferred_element_type=jnp.float32)
    x = x + (attn_acc + bo[0]).reshape(Bt, S, D)

    # ---- MLP with QuickGELU (pre-norm) --------------------------------------
    h = _layernorm(x, ln2_g[0], ln2_b[0])
    h = jnp.dot(h.reshape(Bt * S, D).astype(jnp.bfloat16), wfc[0],
                preferred_element_type=jnp.float32) + bfc[0]
    # TODO(synk): compute the sigmoid gate in bf16 on v6e/v7x (bf16 EUP);
    # kept f32 here so the same kernel is correct/fast on v5e.
    h = h * jax.nn.sigmoid(1.702 * h)
    mlp_out = jnp.dot(h.astype(jnp.bfloat16), wpr[0],
                      preferred_element_type=jnp.float32) + bpr[0]
    x = x + mlp_out.reshape(Bt, S, D)

    acc_ref[...] = x                            # residual stays in VMEM

    # ---- last layer: ln_final on EOT rows + text projection (fused) ---------
    @pl.when(l == num_layers - 1)
    def _():
        # one-hot EOT gather from the live value `x` (no dynamic slices).
        rows = jnp.sum(x * eot_ref[...][:, :, None], axis=1)    # (Bt, D)
        rows = _layernorm(rows, lnf_g[...], lnf_b[...])
        o_ref[...] = jnp.dot(rows.astype(jnp.bfloat16), proj[...],
                             preferred_element_type=jnp.float32)


# ----------------------------- wrapper ---------------------------------------


def _pick_batch_tile(B, max_tile=16):
    """Largest divisor of B that is <= max_tile (never falls back to B)."""
    for t in range(min(B, max_tile), 0, -1):
        if B % t == 0:
            return t
    return 1


def text_encoder_forward(prompts, tokenized_prompts, params, batch_tile=None,
                         vmem_limit_bytes=64 * 1024 * 1024):
    """prompts: (B,S,D) f32 ; tokenized_prompts: (B,S) int32 -> (B,E) f32."""
    B, S, D = prompts.shape
    L = len(params["layers"])
    H = params["num_heads"]
    E = params["text_projection"].shape[1]
    # TODO(synk): on v7x pick Bt so B//Bt is even (>=2) to feed both TCs.
    Bt = batch_tile or _pick_batch_tile(B)
    assert B % Bt == 0

    def stack(key, dtype=jnp.float32):
        return jnp.stack([lp[key] for lp in params["layers"]]).astype(dtype)

    ln1_g, ln1_b = stack("ln1_g"), stack("ln1_b")
    wqkv, bqkv = stack("wqkv", WEIGHT_DTYPE), stack("bqkv")
    wo, bo = stack("wo", WEIGHT_DTYPE), stack("bo")
    ln2_g, ln2_b = stack("ln2_g"), stack("ln2_b")
    wfc, bfc = stack("wfc", WEIGHT_DTYPE), stack("bfc")
    wpr, bpr = stack("wpr", WEIGHT_DTYPE), stack("bpr")
    D4 = wfc.shape[-1]

    pos = params["pos_emb"].astype(jnp.float32)
    row = jax.lax.broadcasted_iota(jnp.int32, (S, S), 0)
    col = jax.lax.broadcasted_iota(jnp.int32, (S, S), 1)
    mask = jnp.where(col <= row, 0.0, NEG_INF).astype(jnp.float32)
    lnf_g = params["lnf_g"].astype(jnp.float32)
    lnf_b = params["lnf_b"].astype(jnp.float32)
    proj = params["text_projection"].astype(WEIGHT_DTYPE)
    eot_idx = jnp.argmax(tokenized_prompts, axis=-1)
    eot_onehot = jax.nn.one_hot(eot_idx, S, dtype=jnp.float32)   # (B, S)

    batch3 = lambda bt, l: (bt, 0, 0)
    layer3 = lambda bt, l: (l, 0, 0)
    const2 = lambda bt, l: (0, 0)
    batch2 = lambda bt, l: (bt, 0)

    in_specs = [
        pl.BlockSpec((Bt, S, D), batch3),        # prompts
        pl.BlockSpec((S, D), const2),            # positional embedding
        pl.BlockSpec((S, S), const2),            # additive causal mask
        pl.BlockSpec((Bt, S), batch2),           # one-hot EOT selector
        pl.BlockSpec((1, 1, D), layer3),         # ln1_g
        pl.BlockSpec((1, 1, D), layer3),         # ln1_b
        pl.BlockSpec((1, D, 3 * D), layer3),     # wqkv (bf16)
        pl.BlockSpec((1, 1, 3 * D), layer3),     # bqkv
        pl.BlockSpec((1, D, D), layer3),         # wo (bf16)
        pl.BlockSpec((1, 1, D), layer3),         # bo
        pl.BlockSpec((1, 1, D), layer3),         # ln2_g
        pl.BlockSpec((1, 1, D), layer3),         # ln2_b
        pl.BlockSpec((1, D, D4), layer3),        # wfc (bf16)
        pl.BlockSpec((1, 1, D4), layer3),        # bfc
        pl.BlockSpec((1, D4, D), layer3),        # wpr (bf16)
        pl.BlockSpec((1, 1, D), layer3),         # bpr
        pl.BlockSpec((1, D), const2),            # ln_final gamma
        pl.BlockSpec((1, D), const2),            # ln_final beta
        pl.BlockSpec((D, E), const2),            # text_projection (bf16)
    ]

    grid_spec = pltpu.PrefetchScalarGridSpec(
        num_scalar_prefetch=0,
        grid=(B // Bt, L),
        in_specs=in_specs,
        out_specs=pl.BlockSpec((Bt, E), lambda bt, l: (bt, 0)),
        scratch_shapes=[pltpu.VMEM((Bt, S, D), jnp.float32)],
    )

    kernel = functools.partial(fused_kernel, num_heads=H, num_layers=L)
    return pl.pallas_call(
        kernel,
        out_shape=jax.ShapeDtypeStruct((B, E), jnp.float32),
        grid_spec=grid_spec,
        compiler_params=pltpu.CompilerParams(
            dimension_semantics=("parallel", "arbitrary"),
            vmem_limit_bytes=vmem_limit_bytes),
    )(prompts.astype(jnp.float32), pos, mask, eot_onehot,
      ln1_g, ln1_b, wqkv, bqkv, wo, bo,
      ln2_g, ln2_b, wfc, bfc, wpr, bpr,
      lnf_g, lnf_b, proj)


# ----------------------------- reference (pure JAX, f32) ---------------------


def text_encoder_reference(prompts, tokenized_prompts, params):
    x = prompts + params["pos_emb"]
    B, S, D = x.shape
    H = params["num_heads"]
    hd = D // H
    for p in params["layers"]:
        h = _layernorm(x, p["ln1_g"], p["ln1_b"])
        qkv = h @ p["wqkv"] + p["bqkv"]
        q = qkv[..., :D].reshape(B, S, H, hd)
        k = qkv[..., D:2 * D].reshape(B, S, H, hd)
        v = qkv[..., 2 * D:].reshape(B, S, H, hd)
        sc = jnp.einsum('bqhd,bkhd->bhqk', q, k) / (hd ** 0.5)
        m = jnp.tril(jnp.ones((S, S), bool))
        sc = jnp.where(m[None, None], sc, -jnp.inf)
        pr = jax.nn.softmax(sc, axis=-1)
        attn = jnp.einsum('bhqk,bkhd->bqhd', pr, v).reshape(B, S, D)
        x = x + attn @ p["wo"] + p["bo"]
        h = _layernorm(x, p["ln2_g"], p["ln2_b"])
        h = h @ p["wfc"] + p["bfc"]
        h = h * jax.nn.sigmoid(1.702 * h)
        x = x + h @ p["wpr"] + p["bpr"]
    x = _layernorm(x, params["lnf_g"], params["lnf_b"])
    eot = jnp.argmax(tokenized_prompts, axis=-1)
    return x[jnp.arange(B), eot] @ params["text_projection"]


# ----------------------------- setup -----------------------------------------


def make_params(key, S, D, E, num_layers, num_heads):
    params = {"num_heads": num_heads, "layers": []}
    key, k_pos, k_proj = jax.random.split(key, 3)
    params["pos_emb"] = 0.02 * jax.random.normal(k_pos, (S, D), jnp.float32)
    params["text_projection"] = 0.02 * jax.random.normal(k_proj, (D, E),
                                                         jnp.float32)
    params["lnf_g"] = jnp.ones((1, D), jnp.float32)
    params["lnf_b"] = jnp.zeros((1, D), jnp.float32)
    for _ in range(num_layers):
        key, *ks = jax.random.split(key, 5)
        params["layers"].append({
            "ln1_g": jnp.ones((1, D), jnp.float32),
            "ln1_b": jnp.zeros((1, D), jnp.float32),
            "wqkv": 0.02 * jax.random.normal(ks[0], (D, 3 * D), jnp.float32),
            "bqkv": jnp.zeros((1, 3 * D), jnp.float32),
            "wo": 0.02 * jax.random.normal(ks[1], (D, D), jnp.float32),
            "bo": jnp.zeros((1, D), jnp.float32),
            "ln2_g": jnp.ones((1, D), jnp.float32),
            "ln2_b": jnp.zeros((1, D), jnp.float32),
            "wfc": 0.02 * jax.random.normal(ks[2], (D, 4 * D), jnp.float32),
            "bfc": jnp.zeros((1, 4 * D), jnp.float32),
            "wpr": 0.02 * jax.random.normal(ks[3], (4 * D, D), jnp.float32),
            "bpr": jnp.zeros((1, D), jnp.float32),
        })
    return params


def _bf16_round_trip_params(params):
    """Reference uses the same bf16-rounded weights the kernel consumes."""
    rt = lambda a: a.astype(jnp.bfloat16).astype(jnp.float32)
    out = {"num_heads": params["num_heads"],
           "pos_emb": params["pos_emb"],
           "text_projection": rt(params["text_projection"]),
           "lnf_g": params["lnf_g"], "lnf_b": params["lnf_b"],
           "layers": []}
    for p in params["layers"]:
        q = dict(p)
        for k in ("wqkv", "wo", "wfc", "wpr"):
            q[k] = rt(p[k])
        out["layers"].append(q)
    return out


if __name__ == "__main__":
    B, S, D, E = 2, 8, 32, 32
    num_layers, num_heads = 2, 4

    key = jax.random.PRNGKey(0)
    key, k_prompt, k_tok = jax.random.split(key, 3)
    prompts = jax.random.normal(k_prompt, (B, S, D), jnp.float32)
    tokenized_prompts = jax.random.randint(k_tok, (B, S), 0, 49408,
                                           dtype=jnp.int32)
    params = make_params(key, S, D, E, num_layers, num_heads)

    out = text_encoder_forward(prompts, tokenized_prompts, params)
    out = jax.block_until_ready(out)

    ref = text_encoder_reference(prompts, tokenized_prompts,
                                 _bf16_round_trip_params(params))
    assert out.shape == (B, E)
    max_err = float(jnp.max(jnp.abs(out - ref)))
    assert jnp.allclose(out, ref, atol=2e-2, rtol=2e-2), (
        f"mismatch vs reference (max abs err {max_err})")

    print("KERNEL_OK")
</pallas_src>

<mosaic_0001>
module attributes {stable_mosaic.version = 11 : i64} {
  func.func @fused_kernel(%arg0: i32, %arg1: i32, %arg2: memref<2x8x32xf32, #tpu.memory_space<vmem>>, %arg3: memref<8x32xf32, #tpu.memory_space<vmem>>, %arg4: memref<8x8xf32, #tpu.memory_space<vmem>>, %arg5: memref<2x8xf32, #tpu.memory_space<vmem>>, %arg6: memref<1x1x32xf32, #tpu.memory_space<vmem>>, %arg7: memref<1x1x32xf32, #tpu.memory_space<vmem>>, %arg8: memref<1x32x96xbf16, #tpu.memory_space<vmem>>, %arg9: memref<1x1x96xf32, #tpu.memory_space<vmem>>, %arg10: memref<1x32x32xbf16, #tpu.memory_space<vmem>>, %arg11: memref<1x1x32xf32, #tpu.memory_space<vmem>>, %arg12: memref<1x1x32xf32, #tpu.memory_space<vmem>>, %arg13: memref<1x1x32xf32, #tpu.memory_space<vmem>>, %arg14: memref<1x32x128xbf16, #tpu.memory_space<vmem>>, %arg15: memref<1x1x128xf32, #tpu.memory_space<vmem>>, %arg16: memref<1x128x32xbf16, #tpu.memory_space<vmem>>, %arg17: memref<1x1x32xf32, #tpu.memory_space<vmem>>, %arg18: memref<1x32xf32, #tpu.memory_space<vmem>>, %arg19: memref<1x32xf32, #tpu.memory_space<vmem>>, %arg20: memref<32x32xbf16, #tpu.memory_space<vmem>>, %arg21: memref<2x32xf32, #tpu.memory_space<vmem>>, %arg22: memref<2x8x32xf32, #tpu.memory_space<vmem>>) attributes {dimension_semantics = [#tpu.dimension_semantics<parallel>, #tpu.dimension_semantics<arbitrary>], iteration_bounds = array<i64: 1, 2>, scalar_prefetch = 0 : i64, scratch_operands = 1 : i64, tpu.core_type = #tpu.core_type<tc>, window_params = [{transform_indices = @transform_0, window_bounds = array<i64: 2, 8, 32>}, {pipeline_mode = #tpu.pipeline_mode<synchronous>, transform_indices = @transform_1, window_bounds = array<i64: 8, 32>}, {pipeline_mode = #tpu.pipeline_mode<synchronous>, transform_indices = @transform_2, window_bounds = array<i64: 8, 8>}, {transform_indices = @transform_3, window_bounds = array<i64: 2, 8>}, {transform_indices = @transform_4, window_bounds = array<i64: 1, 1, 32>}, {transform_indices = @transform_5, window_bounds = array<i64: 1, 1, 32>}, {transform_indices = @transform_6, window_bounds = array<i64: 1, 32, 96>}, {transform_indices = @transform_7, window_bounds = array<i64: 1, 1, 96>}, {transform_indices = @transform_8, window_bounds = array<i64: 1, 32, 32>}, {transform_indices = @transform_9, window_bounds = array<i64: 1, 1, 32>}, {transform_indices = @transform_10, window_bounds = array<i64: 1, 1, 32>}, {transform_indices = @transform_11, window_bounds = array<i64: 1, 1, 32>}, {transform_indices = @transform_12, window_bounds = array<i64: 1, 32, 128>}, {transform_indices = @transform_13, window_bounds = array<i64: 1, 1, 128>}, {transform_indices = @transform_14, window_bounds = array<i64: 1, 128, 32>}, {transform_indices = @transform_15, window_bounds = array<i64: 1, 1, 32>}, {pipeline_mode = #tpu.pipeline_mode<synchronous>, transform_indices = @transform_16, window_bounds = array<i64: 1, 32>}, {pipeline_mode = #tpu.pipeline_mode<synchronous>, transform_indices = @transform_17, window_bounds = array<i64: 1, 32>}, {pipeline_mode = #tpu.pipeline_mode<synchronous>, transform_indices = @transform_18, window_bounds = array<i64: 32, 32>}, {transform_indices = @transform_19, window_bounds = array<i64: 2, 32>}]} {
    %c0_i32 = arith.constant 0 : i32
    %0 = arith.cmpi eq, %arg1, %c0_i32 : i32
    %1 = arith.extui %0 : i1 to i32
    %c0_i32_0 = arith.constant 0 : i32
    %2 = arith.cmpi ne, %1, %c0_i32_0 : i32
    scf.if %2 {
      %c0_84 = arith.constant 0 : index
      %c0_85 = arith.constant 0 : index
      %c0_86 = arith.constant 0 : index
      %220 = vector.load %arg2[%c0_84, %c0_85, %c0_86] : memref<2x8x32xf32, #tpu.memory_space<vmem>>, vector<2x8x32xf32>
      %c0_87 = arith.constant 0 : index
      %c0_88 = arith.constant 0 : index
      %221 = vector.load %arg3[%c0_87, %c0_88] : memref<8x32xf32, #tpu.memory_space<vmem>>, vector<8x32xf32>
      %222 = vector.shape_cast %221 : vector<8x32xf32> to vector<1x8x32xf32>
      %223 = vector.broadcast %222 : vector<1x8x32xf32> to vector<2x8x32xf32>
      %224 = arith.addf %220, %223 : vector<2x8x32xf32>
      %c0_89 = arith.constant 0 : index
      %c0_90 = arith.constant 0 : index
      %c0_91 = arith.constant 0 : index
      %225 = vector.load %arg22[%c0_89, %c0_90, %c0_91] : memref<2x8x32xf32, #tpu.memory_space<vmem>>, vector<2x8x32xf32>
      tpu.vector_store %arg22[%c0_89, %c0_90, %c0_91], %224 {strides = array<i32>} : memref<2x8x32xf32, #tpu.memory_space<vmem>>, vector<2x8x32xf32>,
    } else {
    }
    %c0 = arith.constant 0 : index
    %c0_1 = arith.constant 0 : index
    %c0_2 = arith.constant 0 : index
    %3 = vector.load %arg22[%c0, %c0_1, %c0_2] : memref<2x8x32xf32, #tpu.memory_space<vmem>>, vector<2x8x32xf32>
    %c0_3 = arith.constant 0 : index
    %c0_4 = arith.constant 0 : index
    %c0_5 = arith.constant 0 : index
    %4 = vector.load %arg6[%c0_3, %c0_4, %c0_5] : memref<1x1x32xf32, #tpu.memory_space<vmem>>, vector<1x1x32xf32>
    %5 = vector.shape_cast %4 : vector<1x1x32xf32> to vector<1x32xf32>
    %c0_6 = arith.constant 0 : index
    %c0_7 = arith.constant 0 : index
    %c0_8 = arith.constant 0 : index
    %6 = vector.load %arg7[%c0_6, %c0_7, %c0_8] : memref<1x1x32xf32, #tpu.memory_space<vmem>>, vector<1x1x32xf32>
    %7 = vector.shape_cast %6 : vector<1x1x32xf32> to vector<1x32xf32>
    %cst = arith.constant dense<0.000000e+00> : vector<2x8xf32>
    %8 = vector.multi_reduction <add>, %3, %cst [2] : vector<2x8x32xf32> to vector<2x8xf32>
    %9 = vector.shape_cast %8 : vector<2x8xf32> to vector<2x8x1xf32>
    %cst_9 = arith.constant 3.200000e+01 : f32
    %10 = vector.broadcast %cst_9 : f32 to vector<2x8x1xf32>
    %11 = arith.divf %9, %10 : vector<2x8x1xf32>
    %12 = vector.broadcast %11 : vector<2x8x1xf32> to vector<2x8x32xf32>
    %13 = arith.subf %3, %12 : vector<2x8x32xf32>
    %14 = arith.mulf %13, %13 : vector<2x8x32xf32>
    %cst_10 = arith.constant dense<0.000000e+00> : vector<2x8xf32>
    %15 = vector.multi_reduction <add>, %14, %cst_10 [2] : vector<2x8x32xf32> to vector<2x8xf32>
    %16 = vector.shape_cast %15 : vector<2x8xf32> to vector<2x8x1xf32>
    %cst_11 = arith.constant 3.200000e+01 : f32
    %17 = vector.broadcast %cst_11 : f32 to vector<2x8x1xf32>
    %18 = arith.divf %16, %17 : vector<2x8x1xf32>
    %19 = vector.broadcast %11 : vector<2x8x1xf32> to vector<2x8x32xf32>
    %20 = arith.subf %3, %19 : vector<2x8x32xf32>
    %cst_12 = arith.constant 9.99999974E-6 : f32
    %21 = vector.broadcast %cst_12 : f32 to vector<2x8x1xf32>
    %22 = arith.addf %18, %21 : vector<2x8x1xf32>
    %23 = math.rsqrt %22 : vector<2x8x1xf32>
    %24 = vector.broadcast %23 : vector<2x8x1xf32> to vector<2x8x32xf32>
    %25 = arith.mulf %20, %24 : vector<2x8x32xf32>
    %26 = vector.shape_cast %5 : vector<1x32xf32> to vector<1x1x32xf32>
    %27 = vector.broadcast %26 : vector<1x1x32xf32> to vector<2x8x32xf32>
    %28 = arith.mulf %25, %27 : vector<2x8x32xf32>
    %29 = vector.shape_cast %7 : vector<1x32xf32> to vector<1x1x32xf32>
    %30 = vector.broadcast %29 : vector<1x1x32xf32> to vector<2x8x32xf32>
    %31 = arith.addf %28, %30 : vector<2x8x32xf32>
    %32 = vector.shape_cast %31 : vector<2x8x32xf32> to vector<16x32xf32>
    %33 = arith.truncf %32 : vector<16x32xf32> to vector<16x32xbf16>
    %c0_13 = arith.constant 0 : index
    %c0_14 = arith.constant 0 : index
    %c0_15 = arith.constant 0 : index
    %34 = vector.load %arg8[%c0_13, %c0_14, %c0_15] : memref<1x32x96xbf16, #tpu.memory_space<vmem>>, vector<1x32x96xbf16>
    %35 = vector.shape_cast %34 : vector<1x32x96xbf16> to vector<32x96xbf16>
    %cst_16 = arith.constant dense<0.000000e+00> : vector<16x96xf32>
    %36 = tpu.matmul %33, %35, %cst_16 {dimension_numbers = #tpu.dot_dimension_numbers<[1], [0], [0], [1], [0, 0, 1, 1], [], []>} : vector<16x32xbf16>, vector<32x96xbf16>, vector<16x96xf32> -> vector<16x96xf32>
    %c0_17 = arith.constant 0 : index
    %c0_18 = arith.constant 0 : index
    %c0_19 = arith.constant 0 : index
    %37 = vector.load %arg9[%c0_17, %c0_18, %c0_19] : memref<1x1x96xf32, #tpu.memory_space<vmem>>, vector<1x1x96xf32>
    %38 = vector.shape_cast %37 : vector<1x1x96xf32> to vector<1x96xf32>
    %39 = vector.broadcast %38 : vector<1x96xf32> to vector<16x96xf32>
    %40 = arith.addf %36, %39 : vector<16x96xf32>
    %41 = vector.shape_cast %40 : vector<16x96xf32> to vector<2x8x96xf32>
    %c0_20 = arith.constant 0 : index
    %c0_21 = arith.constant 0 : index
    %42 = vector.load %arg4[%c0_20, %c0_21] : memref<8x8xf32, #tpu.memory_space<vmem>>, vector<8x8xf32>
    %43 = vector.shape_cast %42 : vector<8x8xf32> to vector<1x8x8xf32>
    %c0_22 = arith.constant 0 : index
    %c0_23 = arith.constant 0 : index
    %c0_24 = arith.constant 0 : index
    %44 = vector.load %arg10[%c0_22, %c0_23, %c0_24] : memref<1x32x32xbf16, #tpu.memory_space<vmem>>, vector<1x32x32xbf16>
    %45 = vector.shape_cast %44 : vector<1x32x32xbf16> to vector<32x32xbf16>
    %cst_25 = arith.constant 0.000000e+00 : f32
    %46 = vector.broadcast %cst_25 : f32 to vector<16x32xf32>
    %47 = vector.extract_strided_slice %41 {offsets = [0, 0, 0], sizes = [2, 8, 8], strides = [1, 1, 1]} : vector<2x8x96xf32> to vector<2x8x8xf32>
    %48 = arith.truncf %47 : vector<2x8x8xf32> to vector<2x8x8xbf16>
    %49 = vector.extract_strided_slice %41 {offsets = [0, 0, 32], sizes = [2, 8, 8], strides = [1, 1, 1]} : vector<2x8x96xf32> to vector<2x8x8xf32>
    %50 = arith.truncf %49 : vector<2x8x8xf32> to vector<2x8x8xbf16>
    %51 = vector.extract_strided_slice %41 {offsets = [0, 0, 64], sizes = [2, 8, 8], strides = [1, 1, 1]} : vector<2x8x96xf32> to vector<2x8x8xf32>
    %52 = arith.truncf %51 : vector<2x8x8xf32> to vector<2x8x8xbf16>
    "tpu.trace_start"() <{level = 10 : i32, message = "bqd,bkd->bqk"}> : () -> ()
    %cst_26 = arith.constant dense<0.000000e+00> : vector<2x8x8xf32>
    %53 = tpu.matmul %48, %50, %cst_26 {dimension_numbers = #tpu.dot_dimension_numbers<[2], [2], [1], [1], [0, 0, 0, 1, 1, 1], [0], [0]>} : vector<2x8x8xbf16>, vector<2x8x8xbf16>, vector<2x8x8xf32> -> vector<2x8x8xf32>
    "tpu.trace_stop"() : () -> ()
    %cst_27 = arith.constant 0.353553385 : f32
    %54 = vector.broadcast %cst_27 : f32 to vector<2x8x8xf32>
    %55 = arith.mulf %53, %54 : vector<2x8x8xf32>
    %56 = vector.broadcast %43 : vector<1x8x8xf32> to vector<2x8x8xf32>
    %57 = arith.addf %55, %56 : vector<2x8x8xf32>
    %cst_28 = arith.constant dense<0xFF800000> : vector<2x8xf32>
    %58 = vector.multi_reduction <maximumf>, %57, %cst_28 [2] : vector<2x8x8xf32> to vector<2x8xf32>
    %59 = vector.shape_cast %58 : vector<2x8xf32> to vector<2x8x1xf32>
    %60 = vector.broadcast %59 : vector<2x8x1xf32> to vector<2x8x8xf32>
    %61 = arith.subf %57, %60 : vector<2x8x8xf32>
    %62 = math.exp %61 : vector<2x8x8xf32>
    %cst_29 = arith.constant dense<0.000000e+00> : vector<2x8xf32>
    %63 = vector.multi_reduction <add>, %62, %cst_29 [2] : vector<2x8x8xf32> to vector<2x8xf32>
    %64 = vector.shape_cast %63 : vector<2x8xf32> to vector<2x8x1xf32>
    %65 = vector.broadcast %64 : vector<2x8x1xf32> to vector<2x8x8xf32>
    %66 = arith.divf %62, %65 : vector<2x8x8xf32>
    %67 = arith.truncf %66 : vector<2x8x8xf32> to vector<2x8x8xbf16>
    "tpu.trace_start"() <{level = 10 : i32, message = "bqk,bkd->bqd"}> : () -> ()
    %cst_30 = arith.constant dense<0.000000e+00> : vector<2x8x8xf32>
    %68 = tpu.matmul %67, %52, %cst_30 {dimension_numbers = #tpu.dot_dimension_numbers<[2], [1], [1], [2], [0, 0, 0, 1, 1, 2], [0], [0]>} : vector<2x8x8xbf16>, vector<2x8x8xbf16>, vector<2x8x8xf32> -> vector<2x8x8xf32>
    "tpu.trace_stop"() : () -> ()
    %69 = vector.shape_cast %68 : vector<2x8x8xf32> to vector<16x8xf32>
    %70 = arith.truncf %69 : vector<16x8xf32> to vector<16x8xbf16>
    %71 = vector.extract_strided_slice %45 {offsets = [0, 0], sizes = [8, 32], strides = [1, 1]} : vector<32x32xbf16> to vector<8x32xbf16>
    %cst_31 = arith.constant dense<0.000000e+00> : vector<16x32xf32>
    %72 = tpu.matmul %70, %71, %cst_31 {dimension_numbers = #tpu.dot_dimension_numbers<[1], [0], [0], [1], [0, 0, 1, 1], [], []>} : vector<16x8xbf16>, vector<8x32xbf16>, vector<16x32xf32> -> vector<16x32xf32>
    %73 = arith.addf %46, %72 : vector<16x32xf32>
    %74 = vector.extract_strided_slice %41 {offsets = [0, 0, 8], sizes = [2, 8, 8], strides = [1, 1, 1]} : vector<2x8x96xf32> to vector<2x8x8xf32>
    %75 = arith.truncf %74 : vector<2x8x8xf32> to vector<2x8x8xbf16>
    %76 = vector.extract_strided_slice %41 {offsets = [0, 0, 40], sizes = [2, 8, 8], strides = [1, 1, 1]} : vector<2x8x96xf32> to vector<2x8x8xf32>
    %77 = arith.truncf %76 : vector<2x8x8xf32> to vector<2x8x8xbf16>
    %78 = vector.extract_strided_slice %41 {offsets = [0, 0, 72], sizes = [2, 8, 8], strides = [1, 1, 1]} : vector<2x8x96xf32> to vector<2x8x8xf32>
    %79 = arith.truncf %78 : vector<2x8x8xf32> to vector<2x8x8xbf16>
    "tpu.trace_start"() <{level = 10 : i32, message = "bqd,bkd->bqk"}> : () -> ()
    %cst_32 = arith.constant dense<0.000000e+00> : vector<2x8x8xf32>
    %80 = tpu.matmul %75, %77, %cst_32 {dimension_numbers = #tpu.dot_dimension_numbers<[2], [2], [1], [1], [0, 0, 0, 1, 1, 1], [0], [0]>} : vector<2x8x8xbf16>, vector<2x8x8xbf16>, vector<2x8x8xf32> -> vector<2x8x8xf32>
    "tpu.trace_stop"() : () -> ()
    %cst_33 = arith.constant 0.353553385 : f32
    %81 = vector.broadcast %cst_33 : f32 to vector<2x8x8xf32>
    %82 = arith.mulf %80, %81 : vector<2x8x8xf32>
    %83 = vector.broadcast %43 : vector<1x8x8xf32> to vector<2x8x8xf32>
    %84 = arith.addf %82, %83 : vector<2x8x8xf32>
    %cst_34 = arith.constant dense<0xFF800000> : vector<2x8xf32>
    %85 = vector.multi_reduction <maximumf>, %84, %cst_34 [2] : vector<2x8x8xf32> to vector<2x8xf32>
    %86 = vector.shape_cast %85 : vector<2x8xf32> to vector<2x8x1xf32>
    %87 = vector.broadcast %86 : vector<2x8x1xf32> to vector<2x8x8xf32>
    %88 = arith.subf %84, %87 : vector<2x8x8xf32>
    %89 = math.exp %88 : vector<2x8x8xf32>
    %cst_35 = arith.constant dense<0.000000e+00> : vector<2x8xf32>
    %90 = vector.multi_reduction <add>, %89, %cst_35 [2] : vector<2x8x8xf32> to vector<2x8xf32>
    %91 = vector.shape_cast %90 : vector<2x8xf32> to vector<2x8x1xf32>
    %92 = vector.broadcast %91 : vector<2x8x1xf32> to vector<2x8x8xf32>
    %93 = arith.divf %89, %92 : vector<2x8x8xf32>
    %94 = arith.truncf %93 : vector<2x8x8xf32> to vector<2x8x8xbf16>
    "tpu.trace_start"() <{level = 10 : i32, message = "bqk,bkd->bqd"}> : () -> ()
    %cst_36 = arith.constant dense<0.000000e+00> : vector<2x8x8xf32>
    %95 = tpu.matmul %94, %79, %cst_36 {dimension_numbers = #tpu.dot_dimension_numbers<[2], [1], [1], [2], [0, 0, 0, 1, 1, 2], [0], [0]>} : vector<2x8x8xbf16>, vector<2x8x8xbf16>, vector<2x8x8xf32> -> vector<2x8x8xf32>
    "tpu.trace_stop"() : () -> ()
    %96 = vector.shape_cast %95 : vector<2x8x8xf32> to vector<16x8xf32>
    %97 = arith.truncf %96 : vector<16x8xf32> to vector<16x8xbf16>
    %98 = vector.extract_strided_slice %45 {offsets = [8, 0], sizes = [8, 32], strides = [1, 1]} : vector<32x32xbf16> to vector<8x32xbf16>
    %cst_37 = arith.constant dense<0.000000e+00> : vector<16x32xf32>
    %99 = tpu.matmul %97, %98, %cst_37 {dimension_numbers = #tpu.dot_dimension_numbers<[1], [0], [0], [1], [0, 0, 1, 1], [], []>} : vector<16x8xbf16>, vector<8x32xbf16>, vector<16x32xf32> -> vector<16x32xf32>
    %100 = arith.addf %73, %99 : vector<16x32xf32>
    %101 = vector.extract_strided_slice %41 {offsets = [0, 0, 16], sizes = [2, 8, 8], strides = [1, 1, 1]} : vector<2x8x96xf32> to vector<2x8x8xf32>
    %102 = arith.truncf %101 : vector<2x8x8xf32> to vector<2x8x8xbf16>
    %103 = vector.extract_strided_slice %41 {offsets = [0, 0, 48], sizes = [2, 8, 8], strides = [1, 1, 1]} : vector<2x8x96xf32> to vector<2x8x8xf32>
    %104 = arith.truncf %103 : vector<2x8x8xf32> to vector<2x8x8xbf16>
    %105 = vector.extract_strided_slice %41 {offsets = [0, 0, 80], sizes = [2, 8, 8], strides = [1, 1, 1]} : vector<2x8x96xf32> to vector<2x8x8xf32>
    %106 = arith.truncf %105 : vector<2x8x8xf32> to vector<2x8x8xbf16>
    "tpu.trace_start"() <{level = 10 : i32, message = "bqd,bkd->bqk"}> : () -> ()
    %cst_38 = arith.constant dense<0.000000e+00> : vector<2x8x8xf32>
    %107 = tpu.matmul %102, %104, %cst_38 {dimension_numbers = #tpu.dot_dimension_numbers<[2], [2], [1], [1], [0, 0, 0, 1, 1, 1], [0], [0]>} : vector<2x8x8xbf16>, vector<2x8x8xbf16>, vector<2x8x8xf32> -> vector<2x8x8xf32>
    "tpu.trace_stop"() : () -> ()
    %cst_39 = arith.constant 0.353553385 : f32
    %108 = vector.broadcast %cst_39 : f32 to vector<2x8x8xf32>
    %109 = arith.mulf %107, %108 : vector<2x8x8xf32>
    %110 = vector.broadcast %43 : vector<1x8x8xf32> to vector<2x8x8xf32>
    %111 = arith.addf %109, %110 : vector<2x8x8xf32>
    %cst_40 = arith.constant dense<0xFF800000> : vector<2x8xf32>
    %112 = vector.multi_reduction <maximumf>, %111, %cst_40 [2] : vector<2x8x8xf32> to vector<2x8xf32>
    %113 = vector.shape_cast %112 : vector<2x8xf32> to vector<2x8x1xf32>
    %114 = vector.broadcast %113 : vector<2x8x1xf32> to vector<2x8x8xf32>
    %115 = arith.subf %111, %114 : vector<2x8x8xf32>
    %116 = math.exp %115 : vector<2x8x8xf32>
    %cst_41 = arith.constant dense<0.000000e+00> : vector<2x8xf32>
    %117 = vector.multi_reduction <add>, %116, %cst_41 [2] : vector<2x8x8xf32> to vector<2x8xf32>
    %118 = vector.shape_cast %117 : vector<2x8xf32> to vector<2x8x1xf32>
    %119 = vector.broadcast %118 : vector<2x8x1xf32> to vector<2x8x8xf32>
    %120 = arith.divf %116, %119 : vector<2x8x8xf32>
    %121 = arith.truncf %120 : vector<2x8x8xf32> to vector<2x8x8xbf16>
    "tpu.trace_start"() <{level = 10 : i32, message = "bqk,bkd->bqd"}> : () -> ()
    %cst_42 = arith.constant dense<0.000000e+00> : vector<2x8x8xf32>
    %122 = tpu.matmul %121, %106, %cst_42 {dimension_numbers = #tpu.dot_dimension_numbers<[2], [1], [1], [2], [0, 0, 0, 1, 1, 2], [0], [0]>} : vector<2x8x8xbf16>, vector<2x8x8xbf16>, vector<2x8x8xf32> -> vector<2x8x8xf32>
    "tpu.trace_stop"() : () -> ()
    %123 = vector.shape_cast %122 : vector<2x8x8xf32> to vector<16x8xf32>
    %124 = arith.truncf %123 : vector<16x8xf32> to vector<16x8xbf16>
    %125 = vector.extract_strided_slice %45 {offsets = [16, 0], sizes = [8, 32], strides = [1, 1]} : vector<32x32xbf16> to vector<8x32xbf16>
    %cst_43 = arith.constant dense<0.000000e+00> : vector<16x32xf32>
    %126 = tpu.matmul %124, %125, %cst_43 {dimension_numbers = #tpu.dot_dimension_numbers<[1], [0], [0], [1], [0, 0, 1, 1], [], []>} : vector<16x8xbf16>, vector<8x32xbf16>, vector<16x32xf32> -> vector<16x32xf32>
    %127 = arith.addf %100, %126 : vector<16x32xf32>
    %128 = vector.extract_strided_slice %41 {offsets = [0, 0, 24], sizes = [2, 8, 8], strides = [1, 1, 1]} : vector<2x8x96xf32> to vector<2x8x8xf32>
    %129 = arith.truncf %128 : vector<2x8x8xf32> to vector<2x8x8xbf16>
    %130 = vector.extract_strided_slice %41 {offsets = [0, 0, 56], sizes = [2, 8, 8], strides = [1, 1, 1]} : vector<2x8x96xf32> to vector<2x8x8xf32>
    %131 = arith.truncf %130 : vector<2x8x8xf32> to vector<2x8x8xbf16>
    %132 = vector.extract_strided_slice %41 {offsets = [0, 0, 88], sizes = [2, 8, 8], strides = [1, 1, 1]} : vector<2x8x96xf32> to vector<2x8x8xf32>
    %133 = arith.truncf %132 : vector<2x8x8xf32> to vector<2x8x8xbf16>
    "tpu.trace_start"() <{level = 10 : i32, message = "bqd,bkd->bqk"}> : () -> ()
    %cst_44 = arith.constant dense<0.000000e+00> : vector<2x8x8xf32>
    %134 = tpu.matmul %129, %131, %cst_44 {dimension_numbers = #tpu.dot_dimension_numbers<[2], [2], [1], [1], [0, 0, 0, 1, 1, 1], [0], [0]>} : vector<2x8x8xbf16>, vector<2x8x8xbf16>, vector<2x8x8xf32> -> vector<2x8x8xf32>
    "tpu.trace_stop"() : () -> ()
    %cst_45 = arith.constant 0.353553385 : f32
    %135 = vector.broadcast %cst_45 : f32 to vector<2x8x8xf32>
    %136 = arith.mulf %134, %135 : vector<2x8x8xf32>
    %137 = vector.broadcast %43 : vector<1x8x8xf32> to vector<2x8x8xf32>
    %138 = arith.addf %136, %137 : vector<2x8x8xf32>
    %cst_46 = arith.constant dense<0xFF800000> : vector<2x8xf32>
    %139 = vector.multi_reduction <maximumf>, %138, %cst_46 [2] : vector<2x8x8xf32> to vector<2x8xf32>
    %140 = vector.shape_cast %139 : vector<2x8xf32> to vector<2x8x1xf32>
    %141 = vector.broadcast %140 : vector<2x8x1xf32> to vector<2x8x8xf32>
    %142 = arith.subf %138, %141 : vector<2x8x8xf32>
    %143 = math.exp %142 : vector<2x8x8xf32>
    %cst_47 = arith.constant dense<0.000000e+00> : vector<2x8xf32>
    %144 = vector.multi_reduction <add>, %143, %cst_47 [2] : vector<2x8x8xf32> to vector<2x8xf32>
    %145 = vector.shape_cast %144 : vector<2x8xf32> to vector<2x8x1xf32>
    %146 = vector.broadcast %145 : vector<2x8x1xf32> to vector<2x8x8xf32>
    %147 = arith.divf %143, %146 : vector<2x8x8xf32>
    %148 = arith.truncf %147 : vector<2x8x8xf32> to vector<2x8x8xbf16>
    "tpu.trace_start"() <{level = 10 : i32, message = "bqk,bkd->bqd"}> : () -> ()
    %cst_48 = arith.constant dense<0.000000e+00> : vector<2x8x8xf32>
    %149 = tpu.matmul %148, %133, %cst_48 {dimension_numbers = #tpu.dot_dimension_numbers<[2], [1], [1], [2], [0, 0, 0, 1, 1, 2], [0], [0]>} : vector<2x8x8xbf16>, vector<2x8x8xbf16>, vector<2x8x8xf32> -> vector<2x8x8xf32>
    "tpu.trace_stop"() : () -> ()
    %150 = vector.shape_cast %149 : vector<2x8x8xf32> to vector<16x8xf32>
    %151 = arith.truncf %150 : vector<16x8xf32> to vector<16x8xbf16>
    %152 = vector.extract_strided_slice %45 {offsets = [24, 0], sizes = [8, 32], strides = [1, 1]} : vector<32x32xbf16> to vector<8x32xbf16>
    %cst_49 = arith.constant dense<0.000000e+00> : vector<16x32xf32>
    %153 = tpu.matmul %151, %152, %cst_49 {dimension_numbers = #tpu.dot_dimension_numbers<[1], [0], [0], [1], [0, 0, 1, 1], [], []>} : vector<16x8xbf16>, vector<8x32xbf16>, vector<16x32xf32> -> vector<16x32xf32>
    %154 = arith.addf %127, %153 : vector<16x32xf32>
    %c0_50 = arith.constant 0 : index
    %c0_51 = arith.constant 0 : index
    %c0_52 = arith.constant 0 : index
    %155 = vector.load %arg11[%c0_50, %c0_51, %c0_52] : memref<1x1x32xf32, #tpu.memory_space<vmem>>, vector<1x1x32xf32>
    %156 = vector.shape_cast %155 : vector<1x1x32xf32> to vector<1x32xf32>
    %157 = vector.broadcast %156 : vector<1x32xf32> to vector<16x32xf32>
    %158 = arith.addf %154, %157 : vector<16x32xf32>
    %159 = vector.shape_cast %158 : vector<16x32xf32> to vector<2x8x32xf32>
    %160 = arith.addf %3, %159 : vector<2x8x32xf32>
    %c0_53 = arith.constant 0 : index
    %c0_54 = arith.constant 0 : index
    %c0_55 = arith.constant 0 : index
    %161 = vector.load %arg12[%c0_53, %c0_54, %c0_55] : memref<1x1x32xf32, #tpu.memory_space<vmem>>, vector<1x1x32xf32>
    %162 = vector.shape_cast %161 : vector<1x1x32xf32> to vector<1x32xf32>
    %c0_56 = arith.constant 0 : index
    %c0_57 = arith.constant 0 : index
    %c0_58 = arith.constant 0 : index
    %163 = vector.load %arg13[%c0_56, %c0_57, %c0_58] : memref<1x1x32xf32, #tpu.memory_space<vmem>>, vector<1x1x32xf32>
    %164 = vector.shape_cast %163 : vector<1x1x32xf32> to vector<1x32xf32>
    %cst_59 = arith.constant dense<0.000000e+00> : vector<2x8xf32>
    %165 = vector.multi_reduction <add>, %160, %cst_59 [2] : vector<2x8x32xf32> to vector<2x8xf32>
    %166 = vector.shape_cast %165 : vector<2x8xf32> to vector<2x8x1xf32>
    %cst_60 = arith.constant 3.200000e+01 : f32
    %167 = vector.broadcast %cst_60 : f32 to vector<2x8x1xf32>
    %168 = arith.divf %166, %167 : vector<2x8x1xf32>
    %169 = vector.broadcast %168 : vector<2x8x1xf32> to vector<2x8x32xf32>
    %170 = arith.subf %160, %169 : vector<2x8x32xf32>
    %171 = arith.mulf %170, %170 : vector<2x8x32xf32>
    %cst_61 = arith.constant dense<0.000000e+00> : vector<2x8xf32>
    %172 = vector.multi_reduction <add>, %171, %cst_61 [2] : vector<2x8x32xf32> to vector<2x8xf32>
    %173 = vector.shape_cast %172 : vector<2x8xf32> to vector<2x8x1xf32>
    %cst_62 = arith.constant 3.200000e+01 : f32
    %174 = vector.broadcast %cst_62 : f32 to vector<2x8x1xf32>
    %175 = arith.divf %173, %174 : vector<2x8x1xf32>
    %176 = vector.broadcast %168 : vector<2x8x1xf32> to vector<2x8x32xf32>
    %177 = arith.subf %160, %176 : vector<2x8x32xf32>
    %cst_63 = arith.constant 9.99999974E-6 : f32
    %178 = vector.broadcast %cst_63 : f32 to vector<2x8x1xf32>
    %179 = arith.addf %175, %178 : vector<2x8x1xf32>
    %180 = math.rsqrt %179 : vector<2x8x1xf32>
    %181 = vector.broadcast %180 : vector<2x8x1xf32> to vector<2x8x32xf32>
    %182 = arith.mulf %177, %181 : vector<2x8x32xf32>
    %183 = vector.shape_cast %162 : vector<1x32xf32> to vector<1x1x32xf32>
    %184 = vector.broadcast %183 : vector<1x1x32xf32> to vector<2x8x32xf32>
    %185 = arith.mulf %182, %184 : vector<2x8x32xf32>
    %186 = vector.shape_cast %164 : vector<1x32xf32> to vector<1x1x32xf32>
    %187 = vector.broadcast %186 : vector<1x1x32xf32> to vector<2x8x32xf32>
    %188 = arith.addf %185, %187 : vector<2x8x32xf32>
    %189 = vector.shape_cast %188 : vector<2x8x32xf32> to vector<16x32xf32>
    %190 = arith.truncf %189 : vector<16x32xf32> to vector<16x32xbf16>
    %c0_64 = arith.constant 0 : index
    %c0_65 = arith.constant 0 : index
    %c0_66 = arith.constant 0 : index
    %191 = vector.load %arg14[%c0_64, %c0_65, %c0_66] : memref<1x32x128xbf16, #tpu.memory_space<vmem>>, vector<1x32x128xbf16>
    %192 = vector.shape_cast %191 : vector<1x32x128xbf16> to vector<32x128xbf16>
    %cst_67 = arith.constant dense<0.000000e+00> : vector<16x128xf32>
    %193 = tpu.matmul %190, %192, %cst_67 {dimension_numbers = #tpu.dot_dimension_numbers<[1], [0], [0], [1], [0, 0, 1, 1], [], []>} : vector<16x32xbf16>, vector<32x128xbf16>, vector<16x128xf32> -> vector<16x128xf32>
    %c0_68 = arith.constant 0 : index
    %c0_69 = arith.constant 0 : index
    %c0_70 = arith.constant 0 : index
    %194 = vector.load %arg15[%c0_68, %c0_69, %c0_70] : memref<1x1x128xf32, #tpu.memory_space<vmem>>, vector<1x1x128xf32>
    %195 = vector.shape_cast %194 : vector<1x1x128xf32> to vector<1x128xf32>
    %196 = vector.broadcast %195 : vector<1x128xf32> to vector<16x128xf32>
    %197 = arith.addf %193, %196 : vector<16x128xf32>
    %cst_71 = arith.constant 1.702000e+00 : f32
    %198 = vector.broadcast %cst_71 : f32 to vector<16x128xf32>
    %199 = arith.mulf %198, %197 : vector<16x128xf32>
    %200 = arith.negf %199 : vector<16x128xf32>
    %201 = math.exp %200 : vector<16x128xf32>
    %cst_72 = arith.constant 1.000000e+00 : f32
    %202 = vector.broadcast %cst_72 : f32 to vector<16x128xf32>
    %203 = arith.addf %202, %201 : vector<16x128xf32>
    %204 = arith.divf %202, %203 : vector<16x128xf32>
    %205 = arith.mulf %197, %204 : vector<16x128xf32>
    %206 = arith.truncf %205 : vector<16x128xf32> to vector<16x128xbf16>
    %c0_73 = arith.constant 0 : index
    %c0_74 = arith.constant 0 : index
    %c0_75 = arith.constant 0 : index
    %207 = vector.load %arg16[%c0_73, %c0_74, %c0_75] : memref<1x128x32xbf16, #tpu.memory_space<vmem>>, vector<1x128x32xbf16>
    %208 = vector.shape_cast %207 : vector<1x128x32xbf16> to vector<128x32xbf16>
    %cst_76 = arith.constant dense<0.000000e+00> : vector<16x32xf32>
    %209 = tpu.matmul %206, %208, %cst_76 {dimension_numbers = #tpu.dot_dimension_numbers<[1], [0], [0], [1], [0, 0, 1, 1], [], []>} : vector<16x128xbf16>, vector<128x32xbf16>, vector<16x32xf32> -> vector<16x32xf32>
    %c0_77 = arith.constant 0 : index
    %c0_78 = arith.constant 0 : index
    %c0_79 = arith.constant 0 : index
    %210 = vector.load %arg17[%c0_77, %c0_78, %c0_79] : memref<1x1x32xf32, #tpu.memory_space<vmem>>, vector<1x1x32xf32>
    %211 = vector.shape_cast %210 : vector<1x1x32xf32> to vector<1x32xf32>
    %212 = vector.broadcast %211 : vector<1x32xf32> to vector<16x32xf32>
    %213 = arith.addf %209, %212 : vector<16x32xf32>
    %214 = vector.shape_cast %213 : vector<16x32xf32> to vector<2x8x32xf32>
    %215 = arith.addf %160, %214 : vector<2x8x32xf32>
    %c0_80 = arith.constant 0 : index
    %c0_81 = arith.constant 0 : index
    %c0_82 = arith.constant 0 : index
    %216 = vector.load %arg22[%c0_80, %c0_81, %c0_82] : memref<2x8x32xf32, #tpu.memory_space<vmem>>, vector<2x8x32xf32>
    tpu.vector_store %arg22[%c0_80, %c0_81, %c0_82], %215 {strides = array<i32>} : memref<2x8x32xf32, #tpu.memory_space<vmem>>, vector<2x8x32xf32>,
    %c1_i32 = arith.constant 1 : i32
    %217 = arith.cmpi eq, %arg1, %c1_i32 : i32
    %218 = arith.extui %217 : i1 to i32
    %c0_i32_83 = arith.constant 0 : i32
    %219 = arith.cmpi ne, %218, %c0_i32_83 : i32
    scf.if %219 {
      %c0_84 = arith.constant 0 : index
      %c0_85 = arith.constant 0 : index
      %220 = vector.load %arg5[%c0_84, %c0_85] : memref<2x8xf32, #tpu.memory_space<vmem>>, vector<2x8xf32>
      %221 = vector.shape_cast %220 : vector<2x8xf32> to vector<2x8x1xf32>
      %222 = vector.broadcast %221 : vector<2x8x1xf32> to vector<2x8x32xf32>
      %223 = arith.mulf %215, %222 : vector<2x8x32xf32>
      %cst_86 = arith.constant dense<0.000000e+00> : vector<2x32xf32>
      %224 = vector.multi_reduction <add>, %223, %cst_86 [1] : vector<2x8x32xf32> to vector<2x32xf32>
      %c0_87 = arith.constant 0 : index
      %c0_88 = arith.constant 0 : index
      %225 = vector.load %arg18[%c0_87, %c0_88] : memref<1x32xf32, #tpu.memory_space<vmem>>, vector<1x32xf32>
      %c0_89 = arith.constant 0 : index
      %c0_90 = arith.constant 0 : index
      %226 = vector.load %arg19[%c0_89, %c0_90] : memref<1x32xf32, #tpu.memory_space<vmem>>, vector<1x32xf32>
      %cst_91 = arith.constant dense<0.000000e+00> : vector<2xf32>
      %227 = vector.multi_reduction <add>, %224, %cst_91 [1] : vector<2x32xf32> to vector<2xf32>
      %228 = vector.shape_cast %227 : vector<2xf32> to vector<2x1xf32>
      %cst_92 = arith.constant 3.200000e+01 : f32
      %229 = vector.broadcast %cst_92 : f32 to vector<2x1xf32>
      %230 = arith.divf %228, %229 : vector<2x1xf32>
      %231 = vector.broadcast %230 : vector<2x1xf32> to vector<2x32xf32>
      %232 = arith.subf %224, %231 : vector<2x32xf32>
      %233 = arith.mulf %232, %232 : vector<2x32xf32>
      %cst_93 = arith.constant dense<0.000000e+00> : vector<2xf32>
      %234 = vector.multi_reduction <add>, %233, %cst_93 [1] : vector<2x32xf32> to vector<2xf32>
      %235 = vector.shape_cast %234 : vector<2xf32> to vector<2x1xf32>
      %cst_94 = arith.constant 3.200000e+01 : f32
      %236 = vector.broadcast %cst_94 : f32 to vector<2x1xf32>
      %237 = arith.divf %235, %236 : vector<2x1xf32>
      %238 = vector.broadcast %230 : vector<2x1xf32> to vector<2x32xf32>
      %239 = arith.subf %224, %238 : vector<2x32xf32>
      %cst_95 = arith.constant 9.99999974E-6 : f32
      %240 = vector.broadcast %cst_95 : f32 to vector<2x1xf32>
      %241 = arith.addf %237, %240 : vector<2x1xf32>
      %242 = math.rsqrt %241 : vector<2x1xf32>
      %243 = vector.broadcast %242 : vector<2x1xf32> to vector<2x32xf32>
      %244 = arith.mulf %239, %243 : vector<2x32xf32>
      %245 = vector.broadcast %225 : vector<1x32xf32> to vector<2x32xf32>
      %246 = arith.mulf %244, %245 : vector<2x32xf32>
      %247 = vector.broadcast %226 : vector<1x32xf32> to vector<2x32xf32>
      %248 = arith.addf %246, %247 : vector<2x32xf32>
      %249 = arith.truncf %248 : vector<2x32xf32> to vector<2x32xbf16>
      %c0_96 = arith.constant 0 : index
      %c0_97 = arith.constant 0 : index
      %250 = vector.load %arg20[%c0_96, %c0_97] : memref<32x32xbf16, #tpu.memory_space<vmem>>, vector<32x32xbf16>
      %cst_98 = arith.constant dense<0.000000e+00> : vector<2x32xf32>
      %251 = tpu.matmul %249, %250, %cst_98 {dimension_numbers = #tpu.dot_dimension_numbers<[1], [0], [0], [1], [0, 0, 1, 1], [], []>} : vector<2x32xbf16>, vector<32x32xbf16>, vector<2x32xf32> -> vector<2x32xf32>
      %c0_99 = arith.constant 0 : index
      %c0_100 = arith.constant 0 : index
      %252 = vector.load %arg21[%c0_99, %c0_100] : memref<2x32xf32, #tpu.memory_space<vmem>>, vector<2x32xf32>
      tpu.vector_store %arg21[%c0_99, %c0_100], %251 {strides = array<i32>} : memref<2x32xf32, #tpu.memory_space<vmem>>, vector<2x32xf32>,
    } else {
    }
    return
  }
  func.func @transform_0(%arg0: i32, %arg1: i32) -> (i32, i32, i32) {
    %c0_i32 = arith.constant 0 : i32
    %c0_i32_0 = arith.constant 0 : i32
    %c0_i32_1 = arith.constant 0 : i32
    return %arg0, %c0_i32, %c0_i32_0 : i32, i32, i32
  }
  func.func @transform_1(%arg0: i32, %arg1: i32) -> (i32, i32) {
    %c0_i32 = arith.constant 0 : i32
    %c0_i32_0 = arith.constant 0 : i32
    %c0_i32_1 = arith.constant 0 : i32
    return %c0_i32, %c0_i32_0 : i32, i32
  }
  func.func @transform_2(%arg0: i32, %arg1: i32) -> (i32, i32) {
    %c0_i32 = arith.constant 0 : i32
    %c0_i32_0 = arith.constant 0 : i32
    %c0_i32_1 = arith.constant 0 : i32
    return %c0_i32, %c0_i32_0 : i32, i32
  }
  func.func @transform_3(%arg0: i32, %arg1: i32) -> (i32, i32) {
    %c0_i32 = arith.constant 0 : i32
    %c0_i32_0 = arith.constant 0 : i32
    return %arg0, %c0_i32 : i32, i32
  }
  func.func @transform_4(%arg0: i32, %arg1: i32) -> (i32, i32, i32) {
    %c0_i32 = arith.constant 0 : i32
    %c0_i32_0 = arith.constant 0 : i32
    %c0_i32_1 = arith.constant 0 : i32
    return %arg1, %c0_i32, %c0_i32_0 : i32, i32, i32
  }
  func.func @transform_5(%arg0: i32, %arg1: i32) -> (i32, i32, i32) {
    %c0_i32 = arith.constant 0 : i32
    %c0_i32_0 = arith.constant 0 : i32
    %c0_i32_1 = arith.constant 0 : i32
    return %arg1, %c0_i32, %c0_i32_0 : i32, i32, i32
  }
  func.func @transform_6(%arg0: i32, %arg1: i32) -> (i32, i32, i32) {
    %c0_i32 = arith.constant 0 : i32
    %c0_i32_0 = arith.constant 0 : i32
    %c0_i32_1 = arith.constant 0 : i32
    return %arg1, %c0_i32, %c0_i32_0 : i32, i32, i32
  }
  func.func @transform_7(%arg0: i32, %arg1: i32) -> (i32, i32, i32) {
    %c0_i32 = arith.constant 0 : i32
    %c0_i32_0 = arith.constant 0 : i32
    %c0_i32_1 = arith.constant 0 : i32
    return %arg1, %c0_i32, %c0_i32_0 : i32, i32, i32
  }
  func.func @transform_8(%arg0: i32, %arg1: i32) -> (i32, i32, i32) {
    %c0_i32 = arith.constant 0 : i32
    %c0_i32_0 = arith.constant 0 : i32
    %c0_i32_1 = arith.constant 0 : i32
    return %arg1, %c0_i32, %c0_i32_0 : i32, i32, i32
  }
  func.func @transform_9(%arg0: i32, %arg1: i32) -> (i32, i32, i32) {
    %c0_i32 = arith.constant 0 : i32
    %c0_i32_0 = arith.constant 0 : i32
    %c0_i32_1 = arith.constant 0 : i32
    return %arg1, %c0_i32, %c0_i32_0 : i32, i32, i32
  }
  func.func @transform_10(%arg0: i32, %arg1: i32) -> (i32, i32, i32) {
    %c0_i32 = arith.constant 0 : i32
    %c0_i32_0 = arith.constant 0 : i32
    %c0_i32_1 = arith.constant 0 : i32
    return %arg1, %c0_i32, %c0_i32_0 : i32, i32, i32
  }
  func.func @transform_11(%arg0: i32, %arg1: i32) -> (i32, i32, i32) {
    %c0_i32 = arith.constant 0 : i32
    %c0_i32_0 = arith.constant 0 : i32
    %c0_i32_1 = arith.constant 0 : i32
    return %arg1, %c0_i32, %c0_i32_0 : i32, i32, i32
  }
  func.func @transform_12(%arg0: i32, %arg1: i32) -> (i32, i32, i32) {
    %c0_i32 = arith.constant 0 : i32
    %c0_i32_0 = arith.constant 0 : i32
    %c0_i32_1 = arith.constant 0 : i32
    return %arg1, %c0_i32, %c0_i32_0 : i32, i32, i32
  }
  func.func @transform_13(%arg0: i32, %arg1: i32) -> (i32, i32, i32) {
    %c0_i32 = arith.constant 0 : i32
    %c0_i32_0 = arith.constant 0 : i32
    %c0_i32_1 = arith.constant 0 : i32
    return %arg1, %c0_i32, %c0_i32_0 : i32, i32, i32
  }
  func.func @transform_14(%arg0: i32, %arg1: i32) -> (i32, i32, i32) {
    %c0_i32 = arith.constant 0 : i32
    %c0_i32_0 = arith.constant 0 : i32
    %c0_i32_1 = arith.constant 0 : i32
    return %arg1, %c0_i32, %c0_i32_0 : i32, i32, i32
  }
  func.func @transform_15(%arg0: i32, %arg1: i32) -> (i32, i32, i32) {
    %c0_i32 = arith.constant 0 : i32
    %c0_i32_0 = arith.constant 0 : i32
    %c0_i32_1 = arith.constant 0 : i32
    return %arg1, %c0_i32, %c0_i32_0 : i32, i32, i32
  }
  func.func @transform_16(%arg0: i32, %arg1: i32) -> (i32, i32) {
    %c0_i32 = arith.constant 0 : i32
    %c0_i32_0 = arith.constant 0 : i32
    %c0_i32_1 = arith.constant 0 : i32
    return %c0_i32, %c0_i32_0 : i32, i32
  }
  func.func @transform_17(%arg0: i32, %arg1: i32) -> (i32, i32) {
    %c0_i32 = arith.constant 0 : i32
    %c0_i32_0 = arith.constant 0 : i32
    %c0_i32_1 = arith.constant 0 : i32
    return %c0_i32, %c0_i32_0 : i32, i32
  }
  func.func @transform_18(%arg0: i32, %arg1: i32) -> (i32, i32) {
    %c0_i32 = arith.constant 0 : i32
    %c0_i32_0 = arith.constant 0 : i32
    %c0_i32_1 = arith.constant 0 : i32
    return %c0_i32, %c0_i32_0 : i32, i32
  }
  func.func @transform_19(%arg0: i32, %arg1: i32) -> (i32, i32) {
    %c0_i32 = arith.constant 0 : i32
    %c0_i32_0 = arith.constant 0 : i32
    return %arg0, %c0_i32 : i32, i32
  }
}

</mosaic_0001>

<bundles_post_ra>
// kernel: tpu_custom_call.1
= control target key start
LH: loop header
LB: loop body
LE: loop exit
PB: predicated region body
PF: predicated region fallthrough
CT: control target
= control target key end

     0   :  { %s3662_s0 = inlined_call_operand.vmem [shape: f32[2,8,32], index: 0, kind: input, shape index: {}]   ;;  %s3663_s1 = inlined_call_operand.vmem [shape: f32[8,32], index: 1, kind: input, shape index: {}]   ;;  %s3664_s2 = inlined_call_operand.vmem [shape: f32[8,8], index: 2, kind: input, shape index: {}]   ;;  %s3665_s3 = inlined_call_operand.vmem [shape: f32[2,8], index: 3, kind: input, shape index: {}]   ;;  %s3666_s4 = inlined_call_operand.vmem [shape: f32[2,1,32], index: 4, kind: input, shape index: {}]   ;;  %s3667_s5 = inlined_call_operand.vmem [shape: f32[2,1,32], index: 5, kind: input, shape index: {}]   ;;  %s3668_s6 = inlined_call_operand.vmem [shape: bf16[2,32,96], index: 6, kind: input, shape index: {}]   ;;  %s3669_s7 = inlined_call_operand.vmem [shape: f32[2,1,96], index: 7, kind: input, shape index: {}]   ;;  %s3670_s8 = inlined_call_operand.vmem [shape: bf16[2,32,32], index: 8, kind: input, shape index: {}]   ;;  %s3671_s9 = inlined_call_operand.vmem [shape: f32[2,1,32], index: 9, kind: input, shape index: {}]   ;;  %s3672_s10 = inlined_call_operand.vmem [shape: f32[2,1,32], index: 10, kind: input, shape index: {}]   ;;  %s3673_s11 = inlined_call_operand.vmem [shape: f32[2,1,32], index: 11, kind: input, shape index: {}]   ;;  %s3674_s12 = inlined_call_operand.vmem [shape: bf16[2,32,128], index: 12, kind: input, shape index: {}]   ;;  %s3675_s13 = inlined_call_operand.vmem [shape: f32[2,1,128], index: 13, kind: input, shape index: {}]   ;;  %s3676_s14 = inlined_call_operand.vmem [shape: bf16[2,128,32], index: 14, kind: input, shape index: {}]   ;;  %s3677_s15 = inlined_call_operand.vmem [shape: f32[2,1,32], index: 15, kind: input, shape index: {}]   ;;  %s3678_s16 = inlined_call_operand.vmem [shape: f32[1,32], index: 16, kind: input, shape index: {}]   ;;  %s3679_s17 = inlined_call_operand.vmem [shape: f32[1,32], index: 17, kind: input, shape index: {}]   ;;  %s3680_s18 = inlined_call_operand.vmem [shape: bf16[32,32], index: 18, kind: input, shape index: {}]   ;;  %s3681_s19 = inlined_call_operand.hbm [shape: f32[2,32], index: 19, kind: output, shape index: {}]  }
   0x1   :  { %3686 = sst [smem:[#allocation9_spill]] %s3662_s0 }
   0x2   :  { %3687 = sst [smem:[#allocation10_spill]] %s3663_s1 }
   0x3   :  { %3688 = sst [smem:[#allocation11_spill]] %s3664_s2 }
   0x4   :  { %3689 = sst [smem:[#allocation12_spill]] %s3665_s3 }
   0x5   :  { %3690 = sst [smem:[#allocation13_spill]] %s3668_s6 }
   0x6   :  { %3691 = sst [smem:[#allocation14_spill]] %s3670_s8 }
   0x7   :  { %3692 = sst [smem:[#allocation15_spill]] %s3678_s16 }
   0x8   :  { %3693 = sst [smem:[#allocation16_spill]] %s3679_s17 }
   0x9   :  { %3694 = sst [smem:[#allocation17_spill]] %s3680_s18 }
   0xa   :  { %3695 = sst [smem:[#allocation18_spill]] %s3681_s19 }
   0xb   :  { %24 = vsyncpa [#allocation4], 0  ;;  %s3228_s0 = smov 0   ;;  %s3230_s30 = smov 0  }
   0xc   :  { %s3232_s20 = smov 0  }
   0xd LB: > { %3696 = sst [smem:[#allocation6_spill]] %s3106_s30  ;;  %s39_s1 = sadd.s32 1, %s3106_s30  ;;  %s3110_s20 = sphi %s3232_s20, %s30_s20   ;;  %s3106_s30 = sphi %s3230_s30, %s3719_s30   ;;  %s3102_s0 = sphi %s3228_s0, %s3718_s0  }
   0xe   : > { %3697 = sst [smem:[#allocation7_spill]] %s3110_s20  ;;  %p40_p0 = scmp.ge.s32.totalorder %s39_s1, 2 }
   0xf   : > { %p2660_p1 = scmp.ge.s32.totalorder %s3110_s20, 1  ;;  %p664_p2 = scmp.lt.s32.totalorder %s3110_s20, 3 }
  0x10   : > { %s3721_s1 = smov (%p40_p0, %s39_s1), 0 }
  0x11   : > { %3698 = sst [smem:[#allocation8_spill]] %s3721_s1  ;;  %p665_p3 = pnand %p2660_p1, %p664_p2 }
  0x12   : > { %p773_p4 = scmp.lt.s32.totalorder (!%p665_p3), %s3102_s0, 1  ;;  %s3699_s6 = sld [smem:[#allocation13_spill]] (!%p665_p3) }
  0x13   : > { %668 = sbr.rel (%p665_p3) target bundleno = 4986 (0x137a), region = 96  ;;  %s3700_s8 = sld [smem:[#allocation14_spill]] (!%p665_p3) }
  0x14   : > { %p2669_p5 = scmp.ne.s32.totalorder (!%p665_p3), %s3102_s0, 0 }
  0x18   : > { %s3251_s22 = scalar_select %p773_p4, %s3102_s0, 1 }
  0x19   : > { %s3701_s2 = sld [smem:[#allocation9_spill]] (!%p2669_p5) }
  0x1a   : > { %s2724_s27 = sshll.u32 %s3251_s22, 4  ;;  %s797_s16 = scalar_lea.vmem %s3672_s10, %s3251_s22 }
  0x1b   : > { %s3269_s1 = scalar_lea.vmem %s3699_s6, %s2724_s27  ;;  %s3274_s20 = scalar_lea.vmem %s3700_s8, %s2724_s27 }
  0x1c   : > { %s800_s21 = scalar_lea.vmem %s3673_s11, %s3251_s22  ;;  %s3291_s6 = scalar_lea.vmem %s3674_s12, %s2724_s27 }
  0x1d   : > { %s2727_s18 = sshll.u32 %s3251_s22, 6  ;;  %s816_s28 = scalar_lea.vmem %s3677_s15, %s3251_s22 }
  0x1e   : > { %s3301_s25 = scalar_lea.vmem %s3676_s14, %s2727_s18  ;;  %821 = sbr.rel (%p2669_p5) target bundleno = 41 (0x29), region = 100 }
  0x1f   : > { %s3702_s30 = sld [smem:[#allocation10_spill]] (!%p2669_p5) }
  0x23   : > { %v822_v0 = vld [vmem:[%s3701_s2] sm:$0xff]  ;;  %vm827_vm0 = vcmask 261120   ;;  %v823_v2 = vld [vmem:[%s3701_s2 + $0x8] sm:$0xff] }
  0x25   : > { %v824_v1 = vld [vmem:[%s3702_s30] sm:$0xff] }
  0x26   : > { %v825_v3 = vadd.f32 %v824_v1, %v822_v0  ;;  %v826_v4 = vadd.f32 %v824_v1, %v823_v2 }
  0x28   : > { %828 = vst.msk [vmem:[#allocation2] sm:$0xff] %vm827_vm0, %v825_v3  ;;  %829 = vst.msk [vmem:[#allocation2 + $0x8] sm:$0xff] %vm827_vm0, %v826_v4 }
  0x29 PF: > { %vm834_vm1 = vcmask 261120   ;;  %v2996_v19 = vld [vmem:[%s3269_s1 + $0x8] sm:$0xff]   ;;  %v3112_v20 = vmov 0.0   ;;  %vm3113_vm2 = vmmov 0   ;;  %v2997_v21 = vld [vmem:[%s3269_s1] sm:$0xff]   ;;  %s3703_s1 = scalar_lea.vmem %s3666_s4, %s3251_s22  ;;  %s3704_s3 = scalar_lea.vmem %s3667_s5, %s3251_s22  ;;  %vm956_vm3 = vcmask 64512  }
  0x2a   : > { %2786 = vmatprep.subr.bf16.mxu1 %v3112_v20  ;;  %2790 = vmatprep.mubr.msk.bf16.mxu1 %vm3113_vm2, %v3112_v20  ;;  %v2670_v30 = vld [vmem:[%s3703_s1] ss:$0 sm:$0xff]  ;;  %s3705_s23 = scalar_lea.vmem %s3669_s7, %s3251_s22  ;;  %s3114_s19 = smov 96   ;;  %vm1085_vm4 = vcmask 1043456  }
  0x2b   : > { %2787 = vmatpush3.bf16.msra.mxu1 %v2996_v19  ;;  %2812 = vmatprep.subr.bf16.mxu0 %v3112_v20  ;;  %v2671_v34 = vld [vmem:[%s3704_s3] ss:$0 sm:$0xff]  ;;  %s3706_s8 = sld [smem:[#allocation11_spill]]  ;;  %s3115_s18 = smov 64  }
  0x2c   : > { %2788 = vmatprep.subr.bf16.mxu1 %v3112_v20  ;;  %2814 = vmatprep.mubr.msk.bf16.mxu0 %vm3113_vm2, %v3112_v20  ;;  %v2672_v39 = vld [vmem:[%s3705_s23] ss:$0 sm:$0xff]  ;;  %s3116_s1 = smov 88   ;;  %s3117_s24 = smov 120  }
  0x2d   : > { %s3118_s26 = smov 56   ;;  %s3119_s3 = smov 80  }
  0x2e   : > { %s3120_s29 = smov 112   ;;  %s3121_s27 = smov 48  }
  0x2f   : > { %v3317_v5 = vld [vmem:[#allocation2] sm:$0xff]  ;;  %v3319_v6 = vld [vmem:[#allocation2 + $0x8] sm:$0xff]  ;;  %2789 = vmatpush3.bf16.msra.mxu1 %v2997_v21  ;;  %s3122_s23 = smov 72   ;;  %s3124_s30 = smov 40  }
  0x30   : > { %v835_v7 = vsel %vm834_vm1, %v3317_v5, 0.0  ;;  %v838_v8 = vsel %vm834_vm1, %v3319_v6, 0.0  ;;  %2794 = vmatprep.subr.bf16.mxu1 %v3112_v20  ;;  %p2714_p6 = scmp.ne.s32.totalorder %s3102_s0, 1 }
  0x31   : > { %836 = vadd.xlane.f32.xlu0 %v835_v7  ;;  %v3378_v53 = vld [vmem:[%s3706_s8] sm:$0xff]  ;;  %s3707_s8 = scalar_lea.vmem %s3671_s9, %s3251_s22 }
  0x35   : > { %839 = vadd.xlane.f32.xlu0 %v838_v8 }
  0xba   : > { %v837_v9 = vpop.xlane.xlu0 %836 }
  0xbb   : > { %v842_v10 = vmul.f32 0.03125, %v837_v9 }
  0xbd   : > { %v844_v11 = vsub.f32 %v3317_v5, %v842_v10 }
  0xbe   : > { %v840_v12 = vpop.xlane.xlu0 %839 }
  0xbf   : > { %v843_v13 = vmul.f32 0.03125, %v840_v12  ;;  %v846_v14 = vmul.f32 %v844_v11, %v844_v11 }
  0xc1   : > { %v845_v15 = vsub.f32 %v3319_v6, %v843_v13  ;;  %v848_v16 = vsel %vm834_vm1, %v846_v14, 0.0 }
  0xc2   : > { %849 = vadd.xlane.f32.xlu1 %v848_v16 }
  0xc3   : > { %v847_v17 = vmul.f32 %v845_v15, %v845_v15 }
  0xc5   : > { %v851_v18 = vsel %vm834_vm1, %v847_v17, 0.0 }
  0xc6   : > { %852 = vadd.xlane.f32.xlu1 %v851_v18 }
 0x14b   : > { %v850_v22 = vpop.xlane.xlu1 %849 }
 0x14c   : > { %v854_v23 = vmul.f32 0.03125, %v850_v22 }
 0x14e   : > { %v856_v24 = vadd.f32 1e-05, %v854_v23 }
 0x14f   : > { %v853_v25 = vpop.xlane.xlu1 %852 }
 0x150   : > { %3008 = vrsqrt.f32 %v856_v24  ;;  %v855_v26 = vmul.f32 0.03125, %v853_v25 }
 0x152   : > { %v857_v27 = vadd.f32 1e-05, %v855_v26 }
 0x154   : > { %3010 = vrsqrt.f32 %v857_v27 }
 0x15d   : > { %v3009_v28 = vpop.eup %3008 }
 0x15e   : > { %v860_v29 = vmul.f32 %v3009_v28, %v844_v11 }
 0x160   : > { %v868_v33 = vmul.f32 %v2670_v30, %v860_v29 }
 0x161   : > { %v3011_v31 = vpop.eup %3010 }
 0x162   : > { %v861_v32 = vmul.f32 %v3011_v31, %v845_v15  ;;  %v876_v36 = vadd.f32 %v2671_v34, %v868_v33 }
 0x164   : > { %v869_v35 = vmul.f32 %v2670_v30, %v861_v32 }
 0x166   : > { %v877_v37 = vadd.f32 %v2671_v34, %v869_v35 }
 0x168   : > { %v878_v38 = vpack.c.bf16 %v877_v37, %v876_v36 }
 0x16a   : > { %2791 = vmatmul.mubr.msk.bf16.vlgmr.msra.gmra.mxu1 %vm834_vm1, %v878_v38 }
 0x16b   : > { %2796 = vmatprep.mubr.msk.bf16.mxu1 %vm3113_vm2, %v3112_v20 }
 0x22a   : > { %v939_v40 = vpop.f32.mrf.mxu1 }
 0x22b   : > { %v940_v41 = vadd.f32 %v2672_v39, %v939_v40 }
 0x22c   : > { %v2792_v42 = vpop.f32.mrf.mxu1 }
 0x22d   : > { %v3357_v43 = vpack.c.bf16 %v940_v41, %v940_v41 }
 0x22e   : > { %v942_v44 = vpop.f32.mrf.mxu1 }
 0x22f   : > { %v943_v45 = vadd.f32 %v2672_v39, %v942_v44  ;;  %954 = vrot.lane.b32.xlu0 %v3357_v43, %s3114_s19 }
 0x230   : > { %v2793_v46 = vpop.f32.mrf.mxu1 }
 0x231   : > { %v3360_v47 = vpack.c.bf16 %v943_v45, %v943_v45 }
 0x233   : > { %1004 = vrot.lane.b32.xlu1 %v3360_v47, %s3114_s19  ;;  %s3123_s19 = smov 104  }
 0x2a1   : > { %v955_v48 = vpop.permute.xlu0 %954 }
 0x2a2   : > { %v961_v49 = vsel %vm956_vm3, %v955_v48, 0 }
 0x2a3   : > { %2795 = vmatpush3.bf16.xpose.msra.mxu1 %v961_v49 }
 0x2a4   : > { %2800 = vmatprep.subr.bf16.mxu1 %v3112_v20 }
 0x2a5   : > { %v1005_v50 = vpop.permute.xlu1 %1004 }
 0x2a6   : > { %v1010_v51 = vsel %vm956_vm3, %v1005_v50, 0 }
 0x2aa   : > { %2797 = vmatmul.mubr.msk.bf16.vlgmr.msra.gmra.mxu1 %vm956_vm3, %v3357_v43 }
 0x2ab   : > { %2801 = vmatpush3.bf16.xpose.msra.mxu1 %v1010_v51  ;;  %2802 = vmatprep.mubr.msk.bf16.mxu1 %vm3113_vm2, %v3112_v20 }
 0x2ac   : > { %2806 = vmatprep.subr.bf16.mxu1 %v3112_v20 }
 0x2b2   : > { %2803 = vmatmul.mubr.msk.bf16.vlgmr.msra.gmra.mxu1 %vm956_vm3, %v3360_v47 }
 0x2b3   : > { %2808 = vmatprep.mubr.msk.bf16.mxu1 %vm3113_vm2, %v3112_v20 }
 0x36a   : > { %v997_v52 = vpop.f32.mrf.mxu1 }
 0x36b   : > { %v1052_v54 = vmul.f32 0.35355338, %v997_v52 }
 0x36c   : > { %v2798_v55 = vpop.f32.mrf.mxu1 }
 0x36d   : > { %v1054_v56 = vadd.f32 %v1052_v54, %v3378_v53 }
 0x36e   : > { %v1000_v57 = vpop.f32.mrf.mxu1 }
 0x36f   : > { %v1056_v58 = vsel %vm956_vm3, %v1054_v56, -inf }
 0x370   : > { %1057 = vmax.xlane.f32.xlu1 %v1056_v58  ;;  %v2799_v59 = vpop.f32.mrf.mxu1 }
 0x372   : > { %v1046_v60 = vpop.f32.mrf.mxu1 }
 0x373   : > { %v1053_v61 = vmul.f32 0.35355338, %v1046_v60 }
 0x374   : > { %v2804_v62 = vpop.f32.mrf.mxu1 }
 0x375   : > { %v1055_v63 = vadd.f32 %v1053_v61, %v3378_v53 }
 0x376   : > { %v1049_v0 = vpop.f32.mrf.mxu1 }
 0x377   : > { %v1059_v1 = vsel %vm956_vm3, %v1055_v63, -inf }
 0x378   : > { %1060 = vmax.xlane.f32.xlu0 %v1059_v1  ;;  %v2805_v2 = vpop.f32.mrf.mxu1 }
 0x381   : > { %1129 = vrot.lane.b32.xlu1 %v3360_v47, %s3115_s18 }
 0x385   : > { %1180 = vrot.lane.b32.xlu1 %v3357_v43, %s3116_s1 }
 0x3f9   : > { %v1058_v3 = vpop.xlane.xlu1 %1057 }
 0x3fa   : > { %v1062_v4 = vsub.f32 %v1054_v56, %v1058_v3 }
 0x3fc   : > { %v1064_v7 = vmul.f32 1.442695, %v1062_v4 }
 0x3fd   : > { %v1130_v8 = vpop.permute.xlu1 %1129 }
 0x3fe   : > { %3012 = vpow2.f32 %v1064_v7  ;;  %v1135_v9 = vsel %vm1085_vm4, %v1130_v8, 0 }
 0x3ff   : > { %2813 = vmatpush3.bf16.msra.mxu0 %v1135_v9 }
 0x400   : > { %2824 = vmatprep.subr.bf16.mxu0 %v3112_v20 }
 0x401   : > { %v1061_v10 = vpop.xlane.xlu0 %1060  ;;  %v1181_v18 = vpop.permute.xlu1 %1180 }
 0x402   : > { %v1063_v11 = vsub.f32 %v1055_v63, %v1061_v10  ;;  %v1186_v26 = vsel %vm956_vm3, %v1181_v18, 0  ;;  %v947_v18 = vld [vmem:[%s3274_s20] sm:$0xf] }
 0x404   : > { %v1066_v12 = vmul.f32 1.442695, %v1063_v11 }
 0x406   : > { %3014 = vpow2.f32 %v1066_v12 }
 0x40b   : > { %v3013_v13 = vpop.eup %3012 }
 0x40c   : > { %v1068_v14 = vsel %vm956_vm3, %v3013_v13, 0.0 }
 0x40d   : > { %1069 = vadd.xlane.f32.xlu0 %v1068_v14 }
 0x413   : > { %v3015_v15 = vpop.eup %3014 }
 0x414   : > { %v1071_v16 = vsel %vm956_vm3, %v3015_v15, 0.0 }
 0x415   : > { %1072 = vadd.xlane.f32.xlu1 %v1071_v16 }
 0x423   : > { %1080 = vrot.lane.b32.xlu0 %v3357_v43, %s3115_s18 }
 0x426   : > { %1230 = vrot.lane.b32.xlu1 %v3360_v47, %s3116_s1 }
 0x427   : > { %1178 = vrot.lane.b32.xlu0 %v3357_v43, %s3117_s24 }
 0x42a   : > { %1228 = vrot.lane.b32.xlu1 %v3360_v47, %s3117_s24 }
 0x496   : > { %v1070_v17 = vpop.xlane.xlu0 %1069 }
 0x497   : > { %3016 = vrcp.f32 %v1070_v17 }
 0x49a   : > { %v1081_v19 = vpop.permute.xlu0 %1080 }
 0x49b   : > { %v1087_v21 = vsel %vm1085_vm4, %v1081_v19, 0 }
 0x49c   : > { %2807 = vmatpush3.bf16.msra.mxu1 %v1087_v21 }
 0x49d   : > { %2818 = vmatprep.subr.bf16.mxu1 %v3112_v20 }
 0x49e   : > { %v1073_v22 = vpop.xlane.xlu1 %1072  ;;  %v1179_v31 = vpop.permute.xlu0 %1178 }
 0x49f   : > { %3018 = vrcp.f32 %v1073_v22  ;;  %v1454_v22 = vsel %vm1085_vm4, %v947_v18, 0 }
 0x4a2   : > { %v1231_v29 = vpop.permute.xlu1 %1230 }
 0x4a3   : > { %v1236_v32 = vsel %vm956_vm3, %v1231_v29, 0 }
 0x4a4   : > { %v3017_v23 = vpop.eup %3016 }
 0x4a5   : > { %v1075_v24 = vmul.f32 %v3017_v23, %v3013_v13 }
 0x4a6   : > { %v1229_v33 = vpop.permute.xlu1 %1228 }
 0x4a7   : > { %v1078_v25 = vpack.c.bf16 %v1075_v24, %v1075_v24 }
 0x4a9   : > { %2809 = vmatmul.mubr.msk.bf16.vlgmr.msra.gmra.mxu1 %vm956_vm3, %v1078_v25 }
 0x4aa   : > { %2819 = vmatpush3.bf16.xpose.msra.mxu1 %v1186_v26  ;;  %2820 = vmatprep.mubr.msk.bf16.mxu1 %vm3113_vm2, %v3112_v20 }
 0x4ab   : > { %2830 = vmatprep.subr.bf16.mxu1 %v3112_v20 }
 0x4ac   : > { %v3019_v27 = vpop.eup %3018 }
 0x4ad   : > { %v1077_v28 = vmul.f32 %v3019_v27, %v3015_v15  ;;  %v948_v27 = vld [vmem:[%s3274_s20 + $0x4] sm:$0xf] }
 0x4af   : > { %v1079_v30 = vpack.c.bf16 %v1077_v28, %v1077_v28  ;;  %v1407_v28 = vsel %vm1085_vm4, %v948_v27, 0 }
 0x4b1   : > { %2815 = vmatmul.mubr.msk.bf16.vlgmr.msra.gmra.mxu0 %vm956_vm3, %v1079_v30  ;;  %2821 = vmatmul.mubr.msk.bf16.vlgmr.msra.gmra.mxu1 %vm956_vm3, %v1179_v31 }
 0x4b2   : > { %2825 = vmatpush3.bf16.xpose.msra.mxu0 %v1236_v32  ;;  %2826 = vmatprep.mubr.msk.bf16.mxu0 %vm3113_vm2, %v3112_v20 }
 0x4b3   : > { %2836 = vmatprep.subr.bf16.mxu0 %v3112_v20  ;;  %2832 = vmatprep.mubr.msk.bf16.mxu1 %vm3113_vm2, %v3112_v20 }
 0x4b9   : > { %2827 = vmatmul.mubr.msk.bf16.vlgmr.msra.gmra.mxu0 %vm956_vm3, %v1229_v33 }
 0x4ba   : > { %2838 = vmatprep.mubr.msk.bf16.mxu0 %vm3113_vm2, %v3112_v20 }
 0x569   : > { %v3412_v34 = vpop.f32.mrf.mxu1 }
 0x56b   : > { %v2810_v35 = vpop.f32.mrf.mxu1 }
 0x56d   : > { %v1126_v36 = vpop.f32.mrf.mxu1 }
 0x56f   : > { %v2811_v37 = vpop.f32.mrf.mxu1 }
 0x571   : > { %v3414_v38 = vpop.f32.mrf.mxu0  ;;  %v1222_v39 = vpop.f32.mrf.mxu1 }
 0x572   : > { %v1177_v40 = vpack.c.bf16 %v3414_v38, %v3412_v34  ;;  %v1278_v41 = vmul.f32 0.35355338, %v1222_v39 }
 0x573   : > { %v2816_v42 = vpop.f32.mrf.mxu0  ;;  %v2822_v44 = vpop.f32.mrf.mxu1 }
 0x574   : > { %v1280_v45 = vadd.f32 %v1278_v41, %v3378_v53 }
 0x575   : > { %v1174_v46 = vpop.f32.mrf.mxu0  ;;  %v1225_v48 = vpop.f32.mrf.mxu1 }
 0x576   : > { %v1282_v49 = vsel %vm956_vm3, %v1280_v45, -inf }
 0x577   : > { %v2817_v50 = vpop.f32.mrf.mxu0  ;;  %1283 = vmax.xlane.f32.xlu0 %v1282_v49  ;;  %v2823_v51 = vpop.f32.mrf.mxu1 }
 0x579   : > { %v1272_v52 = vpop.f32.mrf.mxu0 }
 0x57a   : > { %v1279_v54 = vmul.f32 0.35355338, %v1272_v52 }
 0x57b   : > { %v2828_v55 = vpop.f32.mrf.mxu0 }
 0x57c   : > { %v1281_v56 = vadd.f32 %v1279_v54, %v3378_v53 }
 0x57d   : > { %v1275_v57 = vpop.f32.mrf.mxu0 }
 0x57e   : > { %v1285_v58 = vsel %vm956_vm3, %v1281_v56, -inf }
 0x57f   : > { %1286 = vmax.xlane.f32.xlu1 %v1285_v58  ;;  %v2829_v59 = vpop.f32.mrf.mxu0 }
 0x590   : > { %1354 = vrot.lane.b32.xlu1 %v3360_v47, %s3118_s26 }
 0x594   : > { %1499 = vrot.lane.b32.xlu1 %v3357_v43, %s3119_s3 }
 0x598   : > { %1549 = vrot.lane.b32.xlu1 %v3360_v47, %s3119_s3 }
 0x59c   : > { %1547 = vrot.lane.b32.xlu1 %v3360_v47, %s3120_s29 }
 0x600   : > { %v1284_v60 = vpop.xlane.xlu0 %1283 }
 0x601   : > { %v1288_v61 = vsub.f32 %v1280_v45, %v1284_v60 }
 0x603   : > { %v1290_v62 = vmul.f32 1.442695, %v1288_v61 }
 0x605   : > { %3020 = vpow2.f32 %v1290_v62 }
 0x608   : > { %v1287_v63 = vpop.xlane.xlu1 %1286 }
 0x609   : > { %v1289_v0 = vsub.f32 %v1281_v56, %v1287_v63 }
 0x60b   : > { %v1292_v1 = vmul.f32 1.442695, %v1289_v0 }
 0x60c   : > { %v1355_v2 = vpop.permute.xlu1 %1354 }
 0x60d   : > { %3022 = vpow2.f32 %v1292_v1  ;;  %v1360_v3 = vsel %vm1085_vm4, %v1355_v2, 0 }
 0x60e   : > { %2837 = vmatpush3.bf16.msra.mxu0 %v1360_v3 }
 0x60f   : > { %2848 = vmatprep.subr.bf16.mxu0 %v3112_v20 }
 0x610   : > { %v1500_v23 = vpop.permute.xlu1 %1499 }
 0x611   : > { %v1505_v36 = vsel %vm956_vm3, %v1500_v23, 0 }
 0x612   : > { %v3021_v4 = vpop.eup %3020 }
 0x613   : > { %v1294_v7 = vsel %vm956_vm3, %v3021_v4, 0.0 }
 0x614   : > { %1295 = vadd.xlane.f32.xlu0 %v1294_v7  ;;  %v1550_v24 = vpop.permute.xlu1 %1549 }
 0x615   : > { %v1555_v25 = vsel %vm956_vm3, %v1550_v24, 0 }
 0x618   : > { %v1548_v26 = vpop.permute.xlu1 %1547 }
 0x61a   : > { %v3023_v8 = vpop.eup %3022 }
 0x61b   : > { %v1297_v9 = vsel %vm956_vm3, %v3023_v8, 0.0 }
 0x61c   : > { %1298 = vadd.xlane.f32.xlu0 %v1297_v9 }
 0x632   : > { %1306 = vrot.lane.b32.xlu0 %v3357_v43, %s3118_s26  ;;  %s3708_s26 = scalar_lea.vmem %s3675_s13, %s3251_s22 }
 0x636   : > { %1497 = vrot.lane.b32.xlu0 %v3357_v43, %s3120_s29  ;;  %s3709_s29 = sld [smem:[#allocation12_spill]] (!%p2714_p6) }
 0x69d   : > { %v1296_v10 = vpop.xlane.xlu0 %1295 }
 0x69e   : > { %3024 = vrcp.f32 %v1296_v10 }
 0x6a5   : > { %v1299_v11 = vpop.xlane.xlu0 %1298 }
 0x6a6   : > { %3026 = vrcp.f32 %v1299_v11 }
 0x6a9   : > { %v1307_v12 = vpop.permute.xlu0 %1306 }
 0x6aa   : > { %v1312_v13 = vsel %vm1085_vm4, %v1307_v12, 0 }
 0x6ab   : > { %v3025_v14 = vpop.eup %3024  ;;  %2831 = vmatpush3.bf16.msra.mxu1 %v1312_v13 }
 0x6ac   : > { %v1301_v15 = vmul.f32 %v3025_v14, %v3021_v4  ;;  %2842 = vmatprep.subr.bf16.mxu1 %v3112_v20 }
 0x6ae   : > { %v1304_v16 = vpack.c.bf16 %v1301_v15, %v1301_v15 }
 0x6b0   : > { %2833 = vmatmul.mubr.msk.bf16.vlgmr.msra.gmra.mxu1 %vm956_vm3, %v1304_v16 }
 0x6b1   : > { %2844 = vmatprep.mubr.msk.bf16.mxu1 %vm3113_vm2, %v3112_v20  ;;  %2843 = vmatpush3.bf16.msra.mxu1 %v1407_v28 }
 0x6b2   : > { %2854 = vmatprep.subr.bf16.mxu1 %v3112_v20 }
 0x6b3   : > { %v3027_v17 = vpop.eup %3026 }
 0x6b4   : > { %v1303_v19 = vmul.f32 %v3027_v17, %v3023_v8 }
 0x6b6   : > { %v1305_v21 = vpack.c.bf16 %v1303_v19, %v1303_v19 }
 0x6b8   : > { %2839 = vmatmul.mubr.msk.bf16.vlgmr.msra.gmra.mxu0 %vm956_vm3, %v1305_v21 }
 0x6b9   : > { %2849 = vmatpush3.bf16.msra.mxu0 %v1454_v22  ;;  %2850 = vmatprep.mubr.msk.bf16.mxu0 %vm3113_vm2, %v3112_v20 }
 0x6ba   : > { %2860 = vmatprep.subr.bf16.mxu0 %v3112_v20 }
 0x6c0   : > { %2851 = vmatmul.mubr.msk.bf16.vlgmr.msra.gmra.mxu0 %vm956_vm3, %v1177_v40  ;;  %v1498_v40 = vpop.permute.xlu0 %1497 }
 0x6c1   : > { %2861 = vmatpush3.bf16.xpose.msra.mxu0 %v1555_v25  ;;  %2862 = vmatprep.mubr.msk.bf16.mxu0 %vm3113_vm2, %v3112_v20 }
 0x6c2   : > { %2872 = vmatprep.subr.bf16.mxu0 %v3112_v20 }
 0x6c8   : > { %2863 = vmatmul.mubr.msk.bf16.vlgmr.msra.gmra.mxu0 %vm956_vm3, %v1548_v26 }
 0x6c9   : > { %2874 = vmatprep.mubr.msk.bf16.mxu0 %vm3113_vm2, %v3112_v20 }
 0x770   : > { %v1348_v29 = vpop.f32.mrf.mxu1 }
 0x772   : > { %v2834_v30 = vpop.f32.mrf.mxu1 }
 0x774   : > { %v1351_v31 = vpop.f32.mrf.mxu1 }
 0x776   : > { %v2835_v32 = vpop.f32.mrf.mxu1 }
 0x778   : > { %v1396_v33 = vpop.f32.mrf.mxu0 }
 0x779   : > { %v1402_v34 = vpack.c.bf16 %v1396_v33, %v1348_v29  ;;  %v949_v33 = vld [vmem:[%s3274_s20 + $0x8] sm:$0xf] }
 0x77a   : > { %v2840_v35 = vpop.f32.mrf.mxu0 }
 0x77b   : > { %2845 = vmatmul.mubr.msk.bf16.vlgmr.msra.gmra.mxu1 %vm956_vm3, %v1402_v34  ;;  %v1726_v34 = vsel %vm1085_vm4, %v949_v33, 0 }
 0x77c   : > { %2855 = vmatpush3.bf16.xpose.msra.mxu1 %v1505_v36  ;;  %v1399_v37 = vpop.f32.mrf.mxu0  ;;  %2856 = vmatprep.mubr.msk.bf16.mxu1 %vm3113_vm2, %v3112_v20 }
 0x77d   : > { %2866 = vmatprep.subr.bf16.mxu1 %v3112_v20 }
 0x77e   : > { %v2841_v38 = vpop.f32.mrf.mxu0 }
 0x780   : > { %v3462_v39 = vpop.f32.mrf.mxu0 }
 0x782   : > { %v2852_v41 = vpop.f32.mrf.mxu0 }
 0x783   : > { %2857 = vmatmul.mubr.msk.bf16.vlgmr.msra.gmra.mxu1 %vm956_vm3, %v1498_v40 }
 0x784   : > { %v3465_v42 = vpop.f32.mrf.mxu0  ;;  %2868 = vmatprep.mubr.msk.bf16.mxu1 %vm3113_vm2, %v3112_v20 }
 0x786   : > { %v2853_v44 = vpop.f32.mrf.mxu0 }
 0x788   : > { %v1591_v45 = vpop.f32.mrf.mxu0 }
 0x789   : > { %v1598_v46 = vmul.f32 0.35355338, %v1591_v45 }
 0x78a   : > { %v2864_v48 = vpop.f32.mrf.mxu0 }
 0x78b   : > { %v1600_v49 = vadd.f32 %v1598_v46, %v3378_v53 }
 0x78c   : > { %v1594_v50 = vpop.f32.mrf.mxu0 }
 0x78d   : > { %v1604_v51 = vsel %vm956_vm3, %v1600_v49, -inf }
 0x78e   : > { %1605 = vmax.xlane.f32.xlu1 %v1604_v51  ;;  %v2865_v52 = vpop.f32.mrf.mxu0 }
 0x79f   : > { %1673 = vrot.lane.b32.xlu1 %v3360_v47, %s3121_s27 }
 0x7a3   : > { %1773 = vrot.lane.b32.xlu1 %v3357_v43, %s3122_s23 }
 0x7a7   : > { %1823 = vrot.lane.b32.xlu1 %v3360_v47, %s3122_s23  ;;  %s3710_s23 = sld [smem:[#allocation17_spill]] (!%p2714_p6) }
 0x7ab   : > { %1821 = vrot.lane.b32.xlu1 %v3360_v47, %s3123_s19 }
 0x817   : > { %v1606_v54 = vpop.xlane.xlu1 %1605 }
 0x818   : > { %v1608_v57 = vsub.f32 %v1600_v49, %v1606_v54 }
 0x81a   : > { %v1611_v58 = vmul.f32 1.442695, %v1608_v57 }
 0x81b   : > { %v1674_v55 = vpop.permute.xlu1 %1673 }
 0x81c   : > { %v1679_v56 = vsel %vm1085_vm4, %v1674_v55, 0  ;;  %3028 = vpow2.f32 %v1611_v58 }
 0x81d   : > { %2873 = vmatpush3.bf16.msra.mxu0 %v1679_v56 }
 0x81e   : > { %2884 = vmatprep.subr.bf16.mxu0 %v3112_v20 }
 0x81f   : > { %v1774_v18 = vpop.permute.xlu1 %1773 }
 0x820   : > { %v1779_v21 = vsel %vm956_vm3, %v1774_v18, 0 }
 0x823   : > { %v1824_v45 = vpop.permute.xlu1 %1823 }
 0x824   : > { %v1829_v50 = vsel %vm956_vm3, %v1824_v45, 0 }
 0x827   : > { %v1822_v54 = vpop.permute.xlu1 %1821 }
 0x829   : > { %v3029_v7 = vpop.eup %3028 }
 0x82a   : > { %v1616_v9 = vsel %vm956_vm3, %v3029_v7, 0.0 }
 0x83b   : > { %v3479_v59 = vpop.f32.mrf.mxu1 }
 0x83d   : > { %v2846_v60 = vpop.f32.mrf.mxu1 }
 0x83f   : > { %v3481_v61 = vpop.f32.mrf.mxu1 }
 0x841   : > { %v2847_v62 = vpop.f32.mrf.mxu1 }
 0x842   : > { %v1491_v62 = vadd.f32 %v3462_v39, %v3479_v59 }
 0x843   : > { %v1541_v63 = vpop.f32.mrf.mxu1 }
 0x844   : > { %v1597_v0 = vmul.f32 0.35355338, %v1541_v63 }
 0x845   : > { %v2858_v1 = vpop.f32.mrf.mxu1 }
 0x846   : > { %v1599_v2 = vadd.f32 %v1597_v0, %v3378_v53 }
 0x847   : > { %v1544_v3 = vpop.f32.mrf.mxu1 }
 0x848   : > { %v1601_v4 = vsel %vm956_vm3, %v1599_v2, -inf }
 0x849   : > { %1602 = vmax.xlane.f32.xlu0 %v1601_v4  ;;  %v2859_v8 = vpop.f32.mrf.mxu1 }
 0x84d   : > { %1617 = vadd.xlane.f32.xlu0 %v1616_v9 }
 0x8d2   : > { %v1603_v10 = vpop.xlane.xlu0 %1602 }
 0x8d3   : > { %v1607_v11 = vsub.f32 %v1599_v2, %v1603_v10  ;;  %v1494_v2 = vadd.f32 %v3465_v42, %v3481_v61 }
 0x8d5   : > { %v1609_v12 = vmul.f32 1.442695, %v1607_v11 }
 0x8d6   : > { %v1618_v13 = vpop.xlane.xlu0 %1617 }
 0x8d7   : > { %3030 = vpow2.f32 %v1609_v12 }
 0x8d8   : > { %3032 = vrcp.f32 %v1618_v13 }
 0x8e4   : > { %v3031_v14 = vpop.eup %3030 }
 0x8e5   : > { %v3033_v15 = vpop.eup %3032  ;;  %v1613_v16 = vsel %vm956_vm3, %v3031_v14, 0.0 }
 0x8e6   : > { %1614 = vadd.xlane.f32.xlu0 %v1613_v16  ;;  %v1622_v17 = vmul.f32 %v3033_v15, %v3029_v7 }
 0x8e8   : > { %v1624_v19 = vpack.c.bf16 %v1622_v17, %v1622_v17 }
 0x8ea   : > { %2875 = vmatmul.mubr.msk.bf16.vlgmr.msra.gmra.mxu0 %vm956_vm3, %v1624_v19 }
 0x8eb   : > { %2885 = vmatpush3.bf16.xpose.msra.mxu0 %v1779_v21  ;;  %2886 = vmatprep.mubr.msk.bf16.mxu0 %vm3113_vm2, %v3112_v20 }
 0x8ec   : > { %2896 = vmatprep.subr.bf16.mxu0 %v3112_v20 }
 0x8fc   : > { %1625 = vrot.lane.b32.xlu0 %v3357_v43, %s3121_s27 }
 0x900   : > { %1771 = vrot.lane.b32.xlu0 %v3357_v43, %s3123_s19 }
 0x96f   : > { %v1615_v22 = vpop.xlane.xlu0 %1614 }
 0x970   : > { %3034 = vrcp.f32 %v1615_v22 }
 0x973   : > { %v1626_v23 = vpop.permute.xlu0 %1625 }
 0x974   : > { %v1631_v24 = vsel %vm1085_vm4, %v1626_v23, 0 }
 0x975   : > { %2867 = vmatpush3.bf16.msra.mxu1 %v1631_v24 }
 0x976   : > { %2878 = vmatprep.subr.bf16.mxu1 %v3112_v20 }
 0x977   : > { %v1772_v25 = vpop.permute.xlu0 %1771 }
 0x978   : > { %2887 = vmatmul.mubr.msk.bf16.vlgmr.msra.gmra.mxu0 %vm956_vm3, %v1772_v25 }
 0x979   : > { %2898 = vmatprep.mubr.msk.bf16.mxu0 %vm3113_vm2, %v3112_v20 }
 0x97d   : > { %v3035_v26 = vpop.eup %3034 }
 0x97e   : > { %v1620_v27 = vmul.f32 %v3035_v26, %v3031_v14  ;;  %v950_v26 = vld [vmem:[%s3274_s20 + $0xc] sm:$0xf] }
 0x980   : > { %v1623_v28 = vpack.c.bf16 %v1620_v27, %v1620_v27  ;;  %v2000_v27 = vsel %vm1085_vm4, %v950_v26, 0 }
 0x982   : > { %2869 = vmatmul.mubr.msk.bf16.vlgmr.msra.gmra.mxu1 %vm956_vm3, %v1623_v28 }
 0x983   : > { %2880 = vmatprep.mubr.msk.bf16.mxu1 %vm3113_vm2, %v3112_v20  ;;  %2879 = vmatpush3.bf16.msra.mxu1 %v1726_v34 }
 0x984   : > { %2890 = vmatprep.subr.bf16.mxu1 %v3112_v20 }
 0x9aa   : > { %v1715_v29 = vpop.f32.mrf.mxu0 }
 0x9ac   : > { %v2876_v30 = vpop.f32.mrf.mxu0 }
 0x9ae   : > { %v1718_v31 = vpop.f32.mrf.mxu0 }
 0x9b0   : > { %v2877_v32 = vpop.f32.mrf.mxu0 }
 0xa38   : > { %v1815_v35 = vpop.f32.mrf.mxu0 }
 0xa39   : > { %v1871_v36 = vmul.f32 0.35355338, %v1815_v35 }
 0xa3a   : > { %v2888_v37 = vpop.f32.mrf.mxu0 }
 0xa3b   : > { %v1873_v38 = vadd.f32 %v1871_v36, %v3378_v53 }
 0xa3c   : > { %v1818_v40 = vpop.f32.mrf.mxu0 }
 0xa3d   : > { %v1875_v41 = vsel %vm956_vm3, %v1873_v38, -inf }
 0xa3e   : > { %1876 = vmax.xlane.f32.xlu0 %v1875_v41  ;;  %v2889_v44 = vpop.f32.mrf.mxu0 }
 0xa42   : > { %v1667_v46 = vpop.f32.mrf.mxu1 }
 0xa43   : > { %v1721_v48 = vpack.c.bf16 %v1715_v29, %v1667_v46 }
 0xa44   : > { %v2870_v49 = vpop.f32.mrf.mxu1 }
 0xa45   : > { %2881 = vmatmul.mubr.msk.bf16.vlgmr.msra.gmra.mxu1 %vm956_vm3, %v1721_v48 }
 0xa46   : > { %2891 = vmatpush3.bf16.xpose.msra.mxu1 %v1829_v50  ;;  %v1670_v51 = vpop.f32.mrf.mxu1  ;;  %2892 = vmatprep.mubr.msk.bf16.mxu1 %vm3113_vm2, %v3112_v20 }
 0xa47   : > { %2902 = vmatprep.subr.bf16.mxu1 %v3112_v20 }
 0xa48   : > { %v2871_v52 = vpop.f32.mrf.mxu1 }
 0xa4d   : > { %2893 = vmatmul.mubr.msk.bf16.vlgmr.msra.gmra.mxu1 %vm956_vm3, %v1822_v54 }
 0xa4e   : > { %2904 = vmatprep.mubr.msk.bf16.mxu1 %vm3113_vm2, %v3112_v20 }
 0xac7   : > { %v1877_v55 = vpop.xlane.xlu0 %1876 }
 0xac8   : > { %v1881_v56 = vsub.f32 %v1873_v38, %v1877_v55  ;;  %v2696_v38 = vld [vmem:[%s3707_s8] ss:$0 sm:$0xff]  ;;  %s3711_s8 = sld [smem:[#allocation15_spill]] (!%p2714_p6) }
 0xaca   : > { %v1883_v57 = vmul.f32 1.442695, %v1881_v56 }
 0xacc   : > { %3036 = vpow2.f32 %v1883_v57 }
 0xad9   : > { %v3037_v58 = vpop.eup %3036 }
 0xada   : > { %v1887_v60 = vsel %vm956_vm3, %v3037_v58, 0.0 }
 0xadb   : > { %1888 = vadd.xlane.f32.xlu0 %v1887_v60 }
 0xb05   : > { %v1762_v63 = vpop.f32.mrf.mxu1 }
 0xb06   : > { %v3520_v0 = vadd.f32 %v1762_v63, %v1491_v62 }
 0xb07   : > { %v2882_v1 = vpop.f32.mrf.mxu1 }
 0xb08   : > { %v2998_v1 = vld [vmem:[%s3291_s6 + $0x8] sm:$0xff]  }
 0xb09   : > { %v1765_v3 = vpop.f32.mrf.mxu1 }
 0xb0a   : > { %v3524_v4 = vadd.f32 %v1765_v3, %v1494_v2  ;;  %v2999_v2 = vld [vmem:[%s3291_s6] sm:$0xff]   ;;  %s3712_s6 = sld [smem:[#allocation16_spill]] (!%p2714_p6) }
 0xb0b   : > { %v2883_v7 = vpop.f32.mrf.mxu1 }
 0xb0d   : > { %v1865_v8 = vpop.f32.mrf.mxu1 }
 0xb0e   : > { %v1872_v9 = vmul.f32 0.35355338, %v1865_v8 }
 0xb0f   : > { %v2894_v10 = vpop.f32.mrf.mxu1 }
 0xb10   : > { %v1874_v11 = vadd.f32 %v1872_v9, %v3378_v53 }
 0xb11   : > { %v1868_v12 = vpop.f32.mrf.mxu1 }
 0xb12   : > { %v1878_v13 = vsel %vm956_vm3, %v1874_v11, -inf }
 0xb13   : > { %1879 = vmax.xlane.f32.xlu1 %v1878_v13  ;;  %v2895_v39 = vpop.f32.mrf.mxu1  ;;  %v2697_v13 = vld [vmem:[%s797_s16] ss:$0 sm:$0xff] }
 0xb24   : > { %1947 = vrot.lane.b32.xlu1 %v3360_v47, %s3124_s30 }
 0xb64   : > { %v1889_v17 = vpop.xlane.xlu0 %1888 }
 0xb9c   : > { %v1880_v59 = vpop.xlane.xlu1 %1879 }
 0xb9d   : > { %v1882_v14 = vsub.f32 %v1874_v11, %v1880_v59 }
 0xb9f   : > { %v1885_v42 = vmul.f32 1.442695, %v1882_v14 }
 0xba0   : > { %v1948_v61 = vpop.permute.xlu1 %1947 }
 0xba1   : > { %3038 = vpow2.f32 %v1885_v42  ;;  %v1953_v15 = vsel %vm1085_vm4, %v1948_v61, 0  ;;  %v2698_v42 = vld [vmem:[%s800_s21] ss:$0 sm:$0xff] }
 0xba2   : > { %2903 = vmatpush3.bf16.msra.mxu1 %v1953_v15  ;;  %3040 = vrcp.f32 %v1889_v17  ;;  %v3000_v17 = vld [vmem:[%s3301_s25 + $0x38] sm:$0xff]  }
 0xba3   : > { %2914 = vmatprep.subr.bf16.mxu1 %v3112_v20 }
 0xbae   : > { %v3039_v16 = vpop.eup %3038 }
 0xbaf   : > { %v1890_v53 = vsel %vm956_vm3, %v3039_v16, 0.0  ;;  %v3041_v18 = vpop.eup %3040 }
 0xbb0   : > { %1891 = vadd.xlane.f32.xlu0 %v1890_v53  ;;  %v1894_v19 = vmul.f32 %v3041_v18, %v3037_v58  ;;  %v3001_v18 = vld [vmem:[%s3301_s25 + $0x30] sm:$0xff]  }
 0xbb2   : > { %v1897_v23 = vpack.c.bf16 %v1894_v19, %v1894_v19  ;;  %v3003_v19 = vld [vmem:[%s3301_s25 + $0x20] sm:$0xff]  }
 0xbc6   : > { %1899 = vrot.lane.b32.xlu0 %v3357_v43, %s3124_s30 }
 0xc39   : > { %v1892_v47 = vpop.xlane.xlu0 %1891 }
 0xc3a   : > { %3042 = vrcp.f32 %v1892_v47  ;;  %v3002_v47 = vld [vmem:[%s3301_s25 + $0x28] sm:$0xff]  }
 0xc3d   : > { %v1900_v21 = vpop.permute.xlu0 %1899 }
 0xc3e   : > { %v1905_v22 = vsel %vm1085_vm4, %v1900_v21, 0  ;;  %v3004_v21 = vld [vmem:[%s3301_s25 + $0x18] sm:$0xff]  }
 0xc3f   : > { %2897 = vmatpush3.bf16.msra.mxu0 %v1905_v22  ;;  %v3005_v22 = vld [vmem:[%s3301_s25 + $0x10] sm:$0xff]  }
 0xc40   : > { %2908 = vmatprep.subr.bf16.mxu0 %v3112_v20 }
 0xc42   : > { %2899 = vmatmul.mubr.msk.bf16.vlgmr.msra.gmra.mxu0 %vm956_vm3, %v1897_v23  ;;  %v3006_v23 = vld [vmem:[%s3301_s25 + $0x8] sm:$0xff]  }
 0xc43   : > { %2910 = vmatprep.mubr.msk.bf16.mxu0 %vm3113_vm2, %v3112_v20  ;;  %2909 = vmatpush3.bf16.msra.mxu0 %v2000_v27 }
 0xc44   : > { %2922 = vmatprep.subr.bf16.mxu0 %v3112_v20 }
 0xc47   : > { %v3043_v43 = vpop.eup %3042 }
 0xc48   : > { %v1896_v24 = vmul.f32 %v3043_v43, %v3039_v16  ;;  %v3007_v43 = vld [vmem:[%s3301_s25] sm:$0xff]  }
 0xc4a   : > { %v1898_v25 = vpack.c.bf16 %v1896_v24, %v1896_v24  ;;  %v2699_v24 = vld [vmem:[%s3708_s26] ss:$0 sm:$0xff] }
 0xc4c   : > { %2905 = vmatmul.mubr.msk.bf16.vlgmr.msra.gmra.mxu1 %vm956_vm3, %v1898_v25 }
 0xc4d   : > { %2918 = vmatprep.mubr.msk.bf16.mxu1 %vm3113_vm2, %v3112_v20  ;;  %2915 = vmatpush3.bf16.msra.mxu1 %v2998_v1 }
 0xc4e   : > { %2916 = vmatprep.subr.bf16.mxu1 %v3112_v20 }
 0xc51   : > { %2917 = vmatpush3.bf16.msra.mxu1 %v2999_v2 }
 0xd02   : > { %v1941_v28 = vpop.f32.mrf.mxu0 }
 0xd04   : > { %v2900_v29 = vpop.f32.mrf.mxu0 }
 0xd06   : > { %v1944_v30 = vpop.f32.mrf.mxu0 }
 0xd08   : > { %v2901_v31 = vpop.f32.mrf.mxu0 }
 0xd0c   : > { %v1989_v32 = vpop.f32.mrf.mxu1 }
 0xd0d   : > { %v1995_v33 = vpack.c.bf16 %v1989_v32, %v1941_v28 }
 0xd0e   : > { %v2906_v34 = vpop.f32.mrf.mxu1 }
 0xd0f   : > { %2911 = vmatmul.mubr.msk.bf16.vlgmr.msra.gmra.mxu0 %vm956_vm3, %v1995_v33 }
 0xd10   : > { %v1992_v35 = vpop.f32.mrf.mxu1  ;;  %2938 = vmatprep.mubr.msk.bf16.mxu0 %vm3113_vm2, %v3112_v20  ;;  %2923 = vmatpush3.bf16.msra.mxu0 %v3000_v17 }
 0xd11   : > { %2924 = vmatprep.subr.bf16.mxu0 %v3112_v20 }
 0xd12   : > { %v2907_v36 = vpop.f32.mrf.mxu1 }
 0xd14   : > { %2925 = vmatpush3.bf16.msra.mxu0 %v3001_v18 }
 0xd15   : > { %2926 = vmatprep.subr.bf16.mxu0 %v3112_v20 }
 0xd18   : > { %2927 = vmatpush3.bf16.msra.mxu0 %v3002_v47 }
 0xd19   : > { %2928 = vmatprep.subr.bf16.mxu0 %v3112_v20 }
 0xd1c   : > { %2929 = vmatpush3.bf16.msra.mxu0 %v3003_v19 }
 0xd1d   : > { %2930 = vmatprep.subr.bf16.mxu0 %v3112_v20 }
 0xd20   : > { %2931 = vmatpush3.bf16.msra.mxu0 %v3004_v21 }
 0xd21   : > { %2932 = vmatprep.subr.bf16.mxu0 %v3112_v20 }
 0xd24   : > { %2933 = vmatpush3.bf16.msra.mxu0 %v3005_v22 }
 0xd25   : > { %2934 = vmatprep.subr.bf16.mxu0 %v3112_v20 }
 0xd28   : > { %2935 = vmatpush3.bf16.msra.mxu0 %v3006_v23 }
 0xd29   : > { %2936 = vmatprep.subr.bf16.mxu0 %v3112_v20 }
 0xd2c   : > { %2937 = vmatpush3.bf16.msra.mxu0 %v3007_v43 }
 0xdcf   : > { %v2036_v37 = vpop.f32.mrf.mxu0 }
 0xdd0   : > { %v2043_v40 = vadd.f32 %v2036_v37, %v3520_v0 }
 0xdd1   : > { %v2912_v41 = vpop.f32.mrf.mxu0 }
 0xdd2   : > { %v2052_v44 = vadd.f32 %v2696_v38, %v2043_v40 }
 0xdd3   : > { %v2039_v45 = vpop.f32.mrf.mxu0 }
 0xdd4   : > { %v3554_v46 = vadd.f32 %v2052_v44, %v3317_v5  ;;  %v2044_v48 = vadd.f32 %v2039_v45, %v3524_v4 }
 0xdd5   : > { %v2913_v49 = vpop.f32.mrf.mxu0 }
 0xdd6   : > { %v2053_v50 = vadd.f32 %v2696_v38, %v2044_v48  ;;  %v2058_v51 = vsel %vm834_vm1, %v3554_v46, 0.0  ;;  %v2705_v48 = vld [vmem:[%s816_s28] ss:$0 sm:$0xff] }
 0xdd7   : > { %2059 = vadd.xlane.f32.xlu1 %v2058_v51 }
 0xdd8   : > { %v3560_v52 = vadd.f32 %v2053_v50, %v3319_v6 }
 0xdda   : > { %v2061_v54 = vsel %vm834_vm1, %v3560_v52, 0.0 }
 0xddb   : > { %2062 = vadd.xlane.f32.xlu0 %v2061_v54 }
 0xe60   : > { %v2060_v55 = vpop.xlane.xlu1 %2059 }
 0xe61   : > { %v2064_v5 = vmul.f32 0.03125, %v2060_v55 }
 0xe63   : > { %v2066_v56 = vsub.f32 %v3554_v46, %v2064_v5 }
 0xe64   : > { %v2063_v57 = vpop.xlane.xlu0 %2062 }
 0xe65   : > { %v2065_v58 = vmul.f32 0.03125, %v2063_v57  ;;  %v2068_v60 = vmul.f32 %v2066_v56, %v2066_v56 }
 0xe67   : > { %v2067_v62 = vsub.f32 %v3560_v52, %v2065_v58  ;;  %v2070_v63 = vsel %vm834_vm1, %v2068_v60, 0.0 }
 0xe68   : > { %2071 = vadd.xlane.f32.xlu0 %v2070_v63 }
 0xe69   : > { %v2069_v0 = vmul.f32 %v2067_v62, %v2067_v62 }
 0xe6b   : > { %v2073_v6 = vsel %vm834_vm1, %v2069_v0, 0.0 }
 0xe6c   : > { %2074 = vadd.xlane.f32.xlu1 %v2073_v6 }
 0xef1   : > { %v2072_v3 = vpop.xlane.xlu0 %2071 }
 0xef2   : > { %v2076_v4 = vmul.f32 0.03125, %v2072_v3 }
 0xef4   : > { %v2078_v7 = vadd.f32 1e-05, %v2076_v4 }
 0xef5   : > { %v2075_v8 = vpop.xlane.xlu1 %2074 }
 0xef6   : > { %3044 = vrsqrt.f32 %v2078_v7  ;;  %v2077_v9 = vmul.f32 0.03125, %v2075_v8 }
 0xef8   : > { %v2079_v10 = vadd.f32 1e-05, %v2077_v9 }
 0xefa   : > { %3046 = vrsqrt.f32 %v2079_v10 }
 0xf03   : > { %v3045_v11 = vpop.eup %3044 }
 0xf04   : > { %v2082_v12 = vmul.f32 %v3045_v11, %v2066_v56 }
 0xf06   : > { %v2090_v14 = vmul.f32 %v2697_v13, %v2082_v12 }
 0xf07   : > { %v3047_v39 = vpop.eup %3046 }
 0xf08   : > { %v2083_v59 = vmul.f32 %v3047_v39, %v2067_v62  ;;  %v2098_v15 = vadd.f32 %v2698_v42, %v2090_v14 }
 0xf0a   : > { %v2091_v61 = vmul.f32 %v2697_v13, %v2083_v59 }
 0xf0c   : > { %v2099_v16 = vadd.f32 %v2698_v42, %v2091_v61 }
 0xf0e   : > { %v2100_v53 = vpack.c.bf16 %v2099_v16, %v2098_v15 }
 0xf10   : > { %2919 = vmatmul.mubr.msk.bf16.vlgmr.msra.gmra.mxu1 %vm834_vm1, %v2100_v53 }
 0xfd0   : > { %v2161_v25 = vpop.f32.mrf.mxu1 }
 0xfd1   : > { %v2162_v26 = vadd.f32 %v2699_v24, %v2161_v25 }
 0xfd2   : > { %v2920_v27 = vpop.f32.mrf.mxu1 }
 0xfd3   : > { %v2703_v28 = vmul.f32 -1.702, %v2162_v26 }
 0xfd4   : > { %v2164_v29 = vpop.f32.mrf.mxu1 }
 0xfd5   : > { %v2172_v30 = vmul.f32 1.442695, %v2703_v28  ;;  %v2165_v31 = vadd.f32 %v2699_v24, %v2164_v29 }
 0xfd6   : > { %v2921_v32 = vpop.f32.mrf.mxu1 }
 0xfd7   : > { %3048 = vpow2.f32 %v2172_v30  ;;  %v2704_v33 = vmul.f32 -1.702, %v2165_v31 }
 0xfd9   : > { %v2174_v34 = vmul.f32 1.442695, %v2704_v33 }
 0xfdb   : > { %3050 = vpow2.f32 %v2174_v34 }
 0xfe4   : > { %v3049_v20 = vpop.eup %3048 }
 0xfe5   : > { %v2176_v35 = vadd.f32 1.0, %v3049_v20 }
 0xfe7   : > { %3052 = vrcp.f32 %v2176_v35 }
 0xfe8   : > { %v3051_v36 = vpop.eup %3050 }
 0xfe9   : > { %v2177_v37 = vadd.f32 1.0, %v3051_v36 }
 0xfeb   : > { %3054 = vrcp.f32 %v2177_v37 }
 0xff4   : > { %v3053_v38 = vpop.eup %3052 }
 0xff5   : > { %v2182_v41 = vmul.f32 %v3053_v38, %v2162_v26 }
 0xff8   : > { %v3055_v40 = vpop.eup %3054 }
 0xff9   : > { %v2183_v44 = vmul.f32 %v3055_v40, %v2165_v31 }
 0xffb   : > { %v2184_v45 = vpack.c.bf16 %v2183_v44, %v2182_v41 }
 0xffd   : > { %2939 = vmatmul.mubr.bf16.vlgmr.msra.gmra.mxu0 %v2184_v45 }
0x10bd   : > { %v2290_v49 = vpop.f32.mrf.mxu0 }
0x10be   : > { %v2291_v50 = vadd.f32 %v2705_v48, %v2290_v49 }
0x10bf   : > { %v2940_v51 = vpop.f32.mrf.mxu0 }
0x10c0   : > { %v2297_v54 = vadd.f32 %v2291_v50, %v3554_v46 }
0x10c1   : > { %v2293_v55 = vpop.f32.mrf.mxu0 }
0x10c2   : > { %2299 = vst.msk [vmem:[#allocation2] sm:$0xff] %vm834_vm1, %v2297_v54  ;;  %v2294_v5 = vadd.f32 %v2705_v48, %v2293_v55  ;;  %2304 = sbr.rel (%p2714_p6) target bundleno = 4961 (0x1361), region = 104 }
0x10c3   : > { %v2941_v56 = vpop.f32.mrf.mxu0 }
0x10c4   : > { %v2298_v57 = vadd.f32 %v2294_v5, %v3560_v52 }
0x10c6   : > { %2300 = vst.msk [vmem:[#allocation2 + $0x8] sm:$0xff] %vm834_vm1, %v2298_v57 }
0x10c7   : > { %v2306_v58 = vlaneseq  ;;  %v2305_v62 = vld [vmem:[%s3709_s29] sm:$0x3]  ;;  %vm2340_vm5 = vcmask 1041409   ;;  %vm2343_vm6 = vcmask 254976   ;;  %v3056_v26 = vld [vmem:[%s3710_s23 + $0x8] sm:$0xff]   ;;  %v3125_v27 = vmov 0.0  }
0x10c8   : > { %2942 = vmatprep.subr.bf16.mxu0 %v3125_v27  ;;  %vm3126_vm7 = vmmov 0   ;;  %v3057_v28 = vld [vmem:[%s3710_s23] sm:$0xff]  }
0x10c9   : > { %v2307_v60 = vshrl.u32 %v2306_v58, 7  ;;  %2946 = vmatprep.mubr.msk.bf16.mxu0 %vm3126_vm7, %v3125_v27  ;;  %2943 = vmatpush3.bf16.msra.mxu0 %v3056_v26  ;;  %v2715_v33 = vld [vmem:[%s3711_s8] ss:$0 sm:$0xff] }
0x10ca   : > { %2944 = vmatprep.subr.bf16.mxu0 %v3125_v27  ;;  %v2716_v35 = vld [vmem:[%s3712_s6] ss:$0 sm:$0xff] }
0x10cb   : > { %v2308_v63 = vsub.s32 0, %v2307_v60  ;;  %v2315_v46 = vsub.s32 1, %v2307_v60 }
0x10cd   : > { %v2309_v0 = vrot.slane %v2305_v62, %v2308_v63  ;;  %v2316_v6 = vrot.slane %v2305_v62, %v2315_v46  ;;  %2945 = vmatpush3.bf16.msra.mxu0 %v3057_v28 }
0x10cf   : > { %2311 = vbcast.lane.b32.xlu0 %v2309_v0, 256 }
0x10d3   : > { %2318 = vbcast.lane.b32.xlu0 %v2316_v6, 256 }
0x1141   : > { %v2312_v1 = vpop.permute.xlu0 %2311 }
0x1142   : > { %v2320_v2 = vmul.f32 %v2312_v1, %v2297_v54 }
0x1144   : > { %v2322_v52 = vsel %vm834_vm1, %v2320_v2, 0.0 }
0x1145   : > { %v2323_v3 = vrot.slane %v2322_v52, 4  ;;  %v2319_v4 = vpop.permute.xlu0 %2318 }
0x1146   : > { %v2321_v7 = vmul.f32 %v2319_v4, %v2298_v57 }
0x1147   : > { %v2324_v8 = vadd.f32 %v2323_v3, %v2322_v52 }
0x1148   : > { %v2329_v9 = vsel %vm834_vm1, %v2321_v7, 0.0 }
0x1149   : > { %v2325_v10 = vrot.slane %v2324_v8, 2  ;;  %v2330_v11 = vrot.slane %v2329_v9, 4 }
0x114b   : > { %v2326_v12 = vadd.f32 %v2325_v10, %v2324_v8  ;;  %v2331_v13 = vadd.f32 %v2330_v11, %v2329_v9 }
0x114d   : > { %v2332_v39 = vrot.slane %v2331_v13, 2  ;;  %v2327_v59 = vrot.slane %v2326_v12, 1 }
0x114f   : > { %v2333_v14 = vadd.f32 %v2332_v39, %v2331_v13  ;;  %v2328_v61 = vadd.f32 %v2327_v59, %v2326_v12 }
0x1151   : > { %v2334_v42 = vrot.slane %v2333_v14, 1 }
0x1153   : > { %v2335_v15 = vadd.f32 %v2334_v42, %v2333_v14 }
0x1155   : > { %v2341_v16 = vsel %vm2340_vm5, %v2335_v15, %v2328_v61 }
0x1156   : > { %v2344_v53 = vsel %vm2343_vm6, %v2341_v16, 0.0 }
0x1157   : > { %2345 = vadd.xlane.f32.xlu1 %v2344_v53 }
0x11e0   : > { %v2346_v17 = vpop.xlane.xlu1 %2345 }
0x11e1   : > { %v2347_v18 = vmul.f32 0.03125, %v2346_v17 }
0x11e3   : > { %v2349_v47 = vrot.slane %v2347_v18, 1  ;;  %v2352_v19 = vsub.f32 %v2328_v61, %v2347_v18 }
0x11e5   : > { %v2353_v21 = vsub.f32 %v2335_v15, %v2349_v47  ;;  %v2354_v23 = vmul.f32 %v2352_v19, %v2352_v19 }
0x11e7   : > { %v2355_v22 = vmul.f32 %v2353_v21, %v2353_v21 }
0x11e9   : > { %v2358_v43 = vrot.slane %v2355_v22, 7 }
0x11eb   : > { %v2359_v24 = vsel %vm2340_vm5, %v2358_v43, %v2354_v23 }
0x11ec   : > { %v2361_v25 = vsel %vm2343_vm6, %v2359_v24, 0.0 }
0x11ed   : > { %2362 = vadd.xlane.f32.xlu1 %v2361_v25 }
0x1276   : > { %v2363_v29 = vpop.xlane.xlu1 %2362 }
0x1277   : > { %v2364_v30 = vmul.f32 0.03125, %v2363_v29 }
0x1279   : > { %v2365_v31 = vadd.f32 1e-05, %v2364_v30 }
0x127b   : > { %3058 = vrsqrt.f32 %v2365_v31 }
0x1288   : > { %v3059_v32 = vpop.eup %3058 }
0x1289   : > { %v2368_v34 = vrot.slane %v3059_v32, 1  ;;  %v2371_v20 = vmul.f32 %v3059_v32, %v2352_v19 }
0x128b   : > { %v2372_v36 = vmul.f32 %v2368_v34, %v2353_v21  ;;  %v2379_v37 = vmul.f32 %v2715_v33, %v2371_v20 }
0x128d   : > { %v2380_v38 = vmul.f32 %v2715_v33, %v2372_v36  ;;  %v2387_v40 = vadd.f32 %v2716_v35, %v2379_v37 }
0x128f   : > { %v2388_v41 = vadd.f32 %v2716_v35, %v2380_v38  ;;  %v2389_v44 = vpack.c.bf16 %v2387_v40, %v2387_v40 }
0x1291   : > { %v2390_v45 = vpack.c.bf16 %v2388_v41, %v2388_v41  ;;  %v2397_v49 = vunpack.c.l.b16 %v2389_v44 }
0x1293   : > { %v2398_v48 = vunpack.c.l.b16 %v2390_v45 }
0x1295   : > { %v2399_v50 = vrot.slane %v2398_v48, 7 }
0x1297   : > { %v2400_v51 = vsel %vm2340_vm5, %v2399_v50, %v2397_v49 }
0x1298   : > { %v2401_v54 = vpack.c.b16 %v2400_v51, %v2400_v51 }
0x129a   : > { %2947 = vmatmul.mubr.msk.bf16.vlgmr.msra.gmra.mxu0 %vm834_vm1, %v2401_v54 }
0x135a   : > { %v2451_v55 = vpop.f32.mrf.mxu0 }
0x135b   : > { %2457 = vst.msk [vmem:[#allocation3] sm:$0x3] %vm2343_vm6, %v2451_v55 }
0x135c   : > { %v2948_v5 = vpop.f32.mrf.mxu0 }
0x135e   : > { %v2454_v56 = vpop.f32.mrf.mxu0 }
0x1360   : > { %v2949_v57 = vpop.f32.mrf.mxu0 }
0x1361 PF: > { %s3713_s24 = sld [smem:[#allocation7_spill]]  ;;  %s3127_s26 = smov [#allocation3]  }
0x1362   : > { %s2467_s25 = sshll.u32 %s3127_s26, 4  ;;  %s2468_s25 = int_to_ptr.vmem [resolvable:$true] %s2467_s25 }
0x1363   : > { %s3060_s3 = scalar_lea.vmem %s2468_s25, 32  ;;  %p3067_p11 = scmp.lt.s32.totalorder %s2468_s25, %s2468_s25 }
0x1364   : > { %p3061_p8 = scmp.ne.s32.totalorder %s2468_s25, %s3060_s3  ;;  %p3068_p12 = scmp.lt.s32.totalorder %s3060_s3, %s3060_s3 }
0x1366   : > { %p3069_p13 = por %p3068_p12, %p3067_p11 }
0x1367   : > { %s3714_s16 = sadd.s32 4294967295, %s3713_s24  }
0x1368   : > { %p3638_p7 = scmp.eq.s32.totalorder %s3714_s16, 1 }
0x136a   : > { %p3062_p9 = pnand %p3061_p8, %p3638_p7 }
0x136c   : > { %p3063_p10 = pneg %p3062_p9 }
0x136e   : > { %p3070_p0 = pnand %p3069_p13, %p3063_p10 }
0x1370   : > { %3073 = shalt.err (!%p3070_p0)
}
0x1371   : > { %s3716_s29 = sld [smem:[#allocation18_spill]] }
0x1377   : > { %2951 = dma.vmem_to_hbm [thread:$0]  (%p3638_p7), %s2468_s25, 32, %s3716_s29, [#allocation4]  }
0x1378   : > { %3097 = dma.done.wait (%p3638_p7), [#allocation4], 32  }
0x1379   : > { %3099 = vsyncadd (%p3638_p7), [#allocation4], 4294967264 }
0x137a PF: > { %s3717_s0 = sld [smem:[#allocation7_spill]] }
0x137b   : > { %s3719_s30 = sld [smem:[#allocation8_spill]] }
0x1380   : > { %s30_s20 = sadd.s32 1, %s3717_s0   ;;  %s3718_s0 = sld [smem:[#allocation6_spill]] }
0x1381   : > { %p27_p1 = scmp.ge.s32.totalorder %s30_s20, 4  }
0x1383   :  { %29 = sbr.rel (!%p27_p1) target bundleno = 13 (0xd), region = 171 }
0x1388   :  { %2480 = vsyncpa [#allocation4], 1 }
0x1389   :  { %2482 = vsyncpa [#allocation4 + $0x1], 1 }

</bundles_post_ra>
